<compile_context>
chip_gen: v7x
topology: tpu7x:2x2x1
jax: 0.10.0
libtpu: 0.0.40
codegen_flags: <defaults>
</compile_context>

<pallas_src>
import math

import jax
import jax.numpy as jnp
from jax import lax
from jax.experimental import pallas as pl
from jax.experimental.pallas import tpu as pltpu

HIDDEN = 256
LANE = 128   # padded lane width per head / per output slab


def _round_up(x, m):
    return ((x + m - 1) // m) * m


def _make_pi_fc_kernel(deterministic, with_logprob, action_size, block_batch):
    """Kernel body specialized on static mode flags / sizes."""
    A = action_size
    Bt = block_batch
    HALF_LOG_2PI = 0.5 * math.log(2.0 * math.pi)
    LOG2 = math.log(2.0)

    def _mlp_head(x_ref, w1_ref, b1_ref, w2_ref, b2_ref, wh_ref, bh_ref):
        # fc1 + relu (bf16 MXU inputs, f32 accumulate); x is already bf16.
        y1 = jnp.dot(x_ref[...], w1_ref[...],
                     preferred_element_type=jnp.float32) + b1_ref[...]
        y1 = jnp.maximum(y1, 0.0)
        # fc2 + relu
        y2 = jnp.dot(y1.astype(jnp.bfloat16), w2_ref[...],
                     preferred_element_type=jnp.float32) + b2_ref[...]
        y2 = jnp.maximum(y2, 0.0)
        # fused heads: lanes [0:LANE) -> mu, lanes [LANE:2*LANE) -> log_sigma
        # (each zero-padded past A).
        head = jnp.dot(y2.astype(jnp.bfloat16), wh_ref[...],
                       preferred_element_type=jnp.float32) + bh_ref[...]
        return head

    if deterministic:
        def kernel(x_ref, w1_ref, b1_ref, w2_ref, b2_ref, wh_ref, bh_ref,
                   out_ref):
            head = _mlp_head(x_ref, w1_ref, b1_ref, w2_ref, b2_ref,
                             wh_ref, bh_ref)
            out_ref[...] = jnp.tanh(head[:, :LANE])
        return kernel

    def kernel(x_ref, eps_ref, w1_ref, b1_ref, w2_ref, b2_ref, wh_ref, bh_ref,
               out_ref):
        head = _mlp_head(x_ref, w1_ref, b1_ref, w2_ref, b2_ref, wh_ref, bh_ref)
        mu = head[:, :LANE]
        log_sigma = jnp.clip(head[:, LANE:], -20.0, 2.0)
        sigma = jnp.exp(log_sigma)

        eps = eps_ref[...]
        x_t = mu + sigma * eps          # reparameterized sample
        t = jnp.tanh(x_t)

        if not with_logprob:
            out_ref[...] = t
            return

        # Normal(mu, sigma).log_prob(x_t) = -0.5*eps^2 - log_sigma - 0.5*log(2*pi)
        log_prob = -0.5 * eps * eps - log_sigma - HALF_LOG_2PI
        # Stable tanh-squash correction (exact form of the torch 1e-6-guarded
        # log(1 - tanh(x_t)^2)):
        #   log(1 - tanh(x_t)^2) = 2*(log 2 - x_t - softplus(-2*x_t))
        z = -2.0 * x_t
        softplus = jnp.maximum(z, 0.0) + jnp.log1p(jnp.exp(-jnp.abs(z)))
        log_prob = log_prob - 2.0 * (LOG2 - x_t - softplus)
        # Mask padded action lanes and reduce over the action dim.
        lane = lax.broadcasted_iota(jnp.int32, (Bt, LANE), 1)
        log_prob = jnp.where(lane < A, log_prob, 0.0)
        lp = jnp.sum(log_prob, axis=-1, keepdims=True)

        # Fused lane-dense output slab: action in lanes [0:LANE),
        # broadcast log-prob in lanes [LANE:2*LANE).  Both stores are
        # 128-lane aligned (unmasked vst).
        out_ref[:, :LANE] = t
        out_ref[:, LANE:] = jnp.broadcast_to(lp, (Bt, LANE))

    return kernel


def init_pi_fc_params(key, obs_size, action_size):
    """Deterministic init mimicking torch.nn.Linear (uniform +/- 1/sqrt(fan_in))."""
    def linear(key, fan_in, fan_out):
        kw, kb = jax.random.split(key)
        bound = 1.0 / math.sqrt(fan_in)
        w = jax.random.uniform(kw, (fan_in, fan_out), jnp.float32, -bound, bound)
        b = jax.random.uniform(kb, (1, fan_out), jnp.float32, -bound, bound)
        return w, b

    k1, k2, k3, k4 = jax.random.split(key, 4)
    w1, b1 = linear(k1, obs_size, HIDDEN)
    w2, b2 = linear(k2, HIDDEN, HIDDEN)
    wmu, bmu = linear(k3, HIDDEN, action_size)
    wls, bls = linear(k4, HIDDEN, action_size)
    return dict(w1=w1, b1=b1, w2=w2, b2=b2,
                wmu=wmu, bmu=bmu, wls=wls, bls=bls)


def pack_pi_fc_params(params, obs_size, action_size):
    """One-time packing: pad obs dim to x16, fuse heads into 128-lane slots, cast to bf16."""
    K_pad = _round_up(obs_size, 16)
    A = action_size

    w1 = jnp.zeros((K_pad, HIDDEN), jnp.float32).at[:obs_size, :].set(params["w1"])
    wh = jnp.zeros((HIDDEN, 2 * LANE), jnp.float32)
    wh = wh.at[:, :A].set(params["wmu"]).at[:, LANE:LANE + A].set(params["wls"])
    bh = jnp.zeros((1, 2 * LANE), jnp.float32)
    bh = bh.at[:, :A].set(params["bmu"]).at[:, LANE:LANE + A].set(params["bls"])

    return dict(
        w1=w1.astype(jnp.bfloat16),
        b1=params["b1"].astype(jnp.float32),
        w2=params["w2"].astype(jnp.bfloat16),
        b2=params["b2"].astype(jnp.float32),
        wh=wh.astype(jnp.bfloat16),
        bh=bh,
        obs_size=obs_size,
        action_size=action_size,
    )


def pi_fc_forward(packed, x, key=None, eps=None, deterministic=False,
                  with_logprob=False, max_block_batch=1024, num_batch_blocks=1):
    """JAX wrapper matching Pi_FC.forward(x, deterministic, with_logprob).

    num_batch_blocks=1 (default) covers the whole batch in one grid step
    (best on single-TensorCore v5e/v6e at small B); pass 2 on v7x to give
    each TensorCore a right-sized tile.
    """
    B, obs = x.shape
    A = packed["action_size"]
    assert obs == packed["obs_size"]
    K_pad = packed["w1"].shape[0]

    # Generation-aware batch tile: ceil-split across num_batch_blocks, round
    # to a multiple of 16 (bf16 sublane packing), cap at max_block_batch.
    Bt = _round_up(-(-B // num_batch_blocks), 16)
    Bt = min(Bt, _round_up(max_block_batch, 16))
    B_pad = _round_up(B, Bt)
    nb = B_pad // Bt

    # Pad AND cast x to bf16 once (halves the per-step x DMA, no per-step pack).
    x_p = jnp.zeros((B_pad, K_pad), jnp.bfloat16).at[:B, :obs].set(
        x.astype(jnp.bfloat16))

    emit_logprob = (not deterministic) and with_logprob
    kernel = _make_pi_fc_kernel(deterministic, with_logprob, A, Bt)

    row = lambda i: (i, 0)      # batch-tiled operands / outputs
    const = lambda i: (0, 0)    # weights: constant block -> VMEM-resident

    in_specs = [pl.BlockSpec((Bt, K_pad), row)]
    inputs = [x_p]

    if not deterministic:
        # eps ~ N(0, 1): generated host-side (TODO(synk): on-chip pltpu PRNG
        # is unavailable in interpret/CPU lowering, so rsample noise is an input).
        if eps is None:
            if key is None:
                key = jax.random.PRNGKey(0)
            eps_p = jax.random.normal(key, (B_pad, LANE), jnp.float32)
        else:
            eps_p = jnp.zeros((B_pad, LANE), jnp.float32).at[:B, :A].set(
                eps.astype(jnp.float32))
        in_specs.append(pl.BlockSpec((Bt, LANE), row))
        inputs.append(eps_p)

    in_specs += [
        pl.BlockSpec((K_pad, HIDDEN), const),     # w1 (bf16)
        pl.BlockSpec((1, HIDDEN), const),         # b1
        pl.BlockSpec((HIDDEN, HIDDEN), const),    # w2 (bf16)
        pl.BlockSpec((1, HIDDEN), const),         # b2
        pl.BlockSpec((HIDDEN, 2 * LANE), const),  # fused head weights (bf16)
        pl.BlockSpec((1, 2 * LANE), const),       # fused head bias
    ]
    inputs += [packed["w1"], packed["b1"], packed["w2"], packed["b2"],
               packed["wh"], packed["bh"]]

    out_lanes = 2 * LANE if emit_logprob else LANE
    out_shape = jax.ShapeDtypeStruct((B_pad, out_lanes), jnp.float32)
    out_specs = pl.BlockSpec((Bt, out_lanes), row)

    grid_spec = pltpu.PrefetchScalarGridSpec(
        num_scalar_prefetch=0,
        grid=(nb,),
        in_specs=in_specs,
        out_specs=out_specs,
    )

    out = pl.pallas_call(
        kernel,
        out_shape=out_shape,
        grid_spec=grid_spec,
        compiler_params=pltpu.CompilerParams(
            dimension_semantics=("parallel",)),
    )(*inputs)

    if emit_logprob:
        return out[:B, :A], out[:B, LANE:LANE + 1]
    return out[:B, :A], None


if __name__ == "__main__":
    key = jax.random.PRNGKey(0)
    k_params, k_x, k_eps = jax.random.split(key, 3)

    batch = 200            # exercises batch padding (200 -> 208 rows, 1 grid step)
    obs_size = 17          # HalfCheetah observation dim
    action_size = 6        # HalfCheetah action dim

    raw = init_pi_fc_params(k_params, obs_size, action_size)
    packed = pack_pi_fc_params(raw, obs_size, action_size)
    x = jax.random.normal(k_x, (batch, obs_size), jnp.float32)
    eps = jax.random.normal(k_eps, (batch, action_size), jnp.float32)

    # Stochastic path with log-prob (full hot path; explicit eps for a
    # reproducible reference check).
    action, log_prob = pi_fc_forward(packed, x, eps=eps,
                                     deterministic=False, with_logprob=True)
    action = jax.block_until_ready(action)
    log_prob = jax.block_until_ready(log_prob)

    # Deterministic path (tanh(mu), no log-prob).
    det_action, det_lp = pi_fc_forward(packed, x,
                                       deterministic=True, with_logprob=False)
    det_action = jax.block_until_ready(det_action)

    # Pure-JAX f32 reference.
    y1 = jnp.maximum(x @ raw["w1"] + raw["b1"], 0.0)
    y2 = jnp.maximum(y1 @ raw["w2"] + raw["b2"], 0.0)
    mu = y2 @ raw["wmu"] + raw["bmu"]
    ref_det = jnp.tanh(mu)
    log_sigma = jnp.clip(y2 @ raw["wls"] + raw["bls"], -20.0, 2.0)
    sigma = jnp.exp(log_sigma)
    x_t = mu + sigma * eps
    ref_action = jnp.tanh(x_t)
    ref_lp = -0.5 * eps * eps - log_sigma - 0.5 * math.log(2.0 * math.pi)
    # Same stable identity as the kernel (torch adds 1e-6 inside the log as a
    # numerical guard; exact form is used here).
    z = -2.0 * x_t
    ref_lp = ref_lp - 2.0 * (math.log(2.0) - x_t
                             - (jnp.maximum(z, 0.0) + jnp.log1p(jnp.exp(-jnp.abs(z)))))
    ref_lp = jnp.sum(ref_lp, axis=-1, keepdims=True)

    assert action.shape == (batch, action_size)
    assert log_prob.shape == (batch, 1)
    assert det_action.shape == (batch, action_size)
    assert det_lp is None
    assert bool(jnp.all(jnp.abs(action) <= 1.0))
    assert bool(jnp.all(jnp.abs(det_action) <= 1.0))
    assert bool(jnp.all(jnp.isfinite(log_prob)))
    # bf16 weights/activations vs f32 reference: generous but meaningful bounds.
    assert float(jnp.max(jnp.abs(det_action - ref_det))) < 5e-2
    assert float(jnp.max(jnp.abs(action - ref_action))) < 1e-1
    assert float(jnp.max(jnp.abs(log_prob - ref_lp))) < 3e-1

    print("KERNEL_OK")
</pallas_src>

<mosaic_0001>
module attributes {stable_mosaic.version = 11 : i64} {
  func.func @kernel(%arg0: i32, %arg1: memref<208x32xbf16, #tpu.memory_space<vmem>>, %arg2: memref<208x128xf32, #tpu.memory_space<vmem>>, %arg3: memref<32x256xbf16, #tpu.memory_space<vmem>>, %arg4: memref<1x256xf32, #tpu.memory_space<vmem>>, %arg5: memref<256x256xbf16, #tpu.memory_space<vmem>>, %arg6: memref<1x256xf32, #tpu.memory_space<vmem>>, %arg7: memref<256x256xbf16, #tpu.memory_space<vmem>>, %arg8: memref<1x256xf32, #tpu.memory_space<vmem>>, %arg9: memref<208x256xf32, #tpu.memory_space<vmem>>) attributes {dimension_semantics = [#tpu.dimension_semantics<parallel>], iteration_bounds = array<i64: 1>, scalar_prefetch = 0 : i64, scratch_operands = 0 : i64, tpu.core_type = #tpu.core_type<tc>, window_params = [{transform_indices = @transform_0, window_bounds = array<i64: 208, 32>}, {transform_indices = @transform_1, window_bounds = array<i64: 208, 128>}, {pipeline_mode = #tpu.pipeline_mode<synchronous>, transform_indices = @transform_2, window_bounds = array<i64: 32, 256>}, {pipeline_mode = #tpu.pipeline_mode<synchronous>, transform_indices = @transform_3, window_bounds = array<i64: 1, 256>}, {pipeline_mode = #tpu.pipeline_mode<synchronous>, transform_indices = @transform_4, window_bounds = array<i64: 256, 256>}, {pipeline_mode = #tpu.pipeline_mode<synchronous>, transform_indices = @transform_5, window_bounds = array<i64: 1, 256>}, {pipeline_mode = #tpu.pipeline_mode<synchronous>, transform_indices = @transform_6, window_bounds = array<i64: 256, 256>}, {pipeline_mode = #tpu.pipeline_mode<synchronous>, transform_indices = @transform_7, window_bounds = array<i64: 1, 256>}, {transform_indices = @transform_8, window_bounds = array<i64: 208, 256>}]} {
    %c0 = arith.constant 0 : index
    %c0_0 = arith.constant 0 : index
    %0 = vector.load %arg1[%c0, %c0_0] : memref<208x32xbf16, #tpu.memory_space<vmem>>, vector<208x32xbf16>
    %c0_1 = arith.constant 0 : index
    %c0_2 = arith.constant 0 : index
    %1 = vector.load %arg3[%c0_1, %c0_2] : memref<32x256xbf16, #tpu.memory_space<vmem>>, vector<32x256xbf16>
    %cst = arith.constant dense<0.000000e+00> : vector<208x256xf32>
    %2 = tpu.matmul %0, %1, %cst {dimension_numbers = #tpu.dot_dimension_numbers<[1], [0], [0], [1], [0, 0, 1, 1], [], []>} : vector<208x32xbf16>, vector<32x256xbf16>, vector<208x256xf32> -> vector<208x256xf32>
    %c0_3 = arith.constant 0 : index
    %c0_4 = arith.constant 0 : index
    %3 = vector.load %arg4[%c0_3, %c0_4] : memref<1x256xf32, #tpu.memory_space<vmem>>, vector<1x256xf32>
    %4 = vector.broadcast %3 : vector<1x256xf32> to vector<208x256xf32>
    %5 = arith.addf %2, %4 : vector<208x256xf32>
    %cst_5 = arith.constant 0.000000e+00 : f32
    %6 = vector.broadcast %cst_5 : f32 to vector<208x256xf32>
    %7 = arith.maximumf %5, %6 : vector<208x256xf32>
    %8 = arith.truncf %7 : vector<208x256xf32> to vector<208x256xbf16>
    %c0_6 = arith.constant 0 : index
    %c0_7 = arith.constant 0 : index
    %9 = vector.load %arg5[%c0_6, %c0_7] : memref<256x256xbf16, #tpu.memory_space<vmem>>, vector<256x256xbf16>
    %cst_8 = arith.constant dense<0.000000e+00> : vector<208x256xf32>
    %10 = tpu.matmul %8, %9, %cst_8 {dimension_numbers = #tpu.dot_dimension_numbers<[1], [0], [0], [1], [0, 0, 1, 1], [], []>} : vector<208x256xbf16>, vector<256x256xbf16>, vector<208x256xf32> -> vector<208x256xf32>
    %c0_9 = arith.constant 0 : index
    %c0_10 = arith.constant 0 : index
    %11 = vector.load %arg6[%c0_9, %c0_10] : memref<1x256xf32, #tpu.memory_space<vmem>>, vector<1x256xf32>
    %12 = vector.broadcast %11 : vector<1x256xf32> to vector<208x256xf32>
    %13 = arith.addf %10, %12 : vector<208x256xf32>
    %cst_11 = arith.constant 0.000000e+00 : f32
    %14 = vector.broadcast %cst_11 : f32 to vector<208x256xf32>
    %15 = arith.maximumf %13, %14 : vector<208x256xf32>
    %16 = arith.truncf %15 : vector<208x256xf32> to vector<208x256xbf16>
    %c0_12 = arith.constant 0 : index
    %c0_13 = arith.constant 0 : index
    %17 = vector.load %arg7[%c0_12, %c0_13] : memref<256x256xbf16, #tpu.memory_space<vmem>>, vector<256x256xbf16>
    %cst_14 = arith.constant dense<0.000000e+00> : vector<208x256xf32>
    %18 = tpu.matmul %16, %17, %cst_14 {dimension_numbers = #tpu.dot_dimension_numbers<[1], [0], [0], [1], [0, 0, 1, 1], [], []>} : vector<208x256xbf16>, vector<256x256xbf16>, vector<208x256xf32> -> vector<208x256xf32>
    %c0_15 = arith.constant 0 : index
    %c0_16 = arith.constant 0 : index
    %19 = vector.load %arg8[%c0_15, %c0_16] : memref<1x256xf32, #tpu.memory_space<vmem>>, vector<1x256xf32>
    %20 = vector.broadcast %19 : vector<1x256xf32> to vector<208x256xf32>
    %21 = arith.addf %18, %20 : vector<208x256xf32>
    %22 = vector.extract_strided_slice %21 {offsets = [0, 0], sizes = [208, 128], strides = [1, 1]} : vector<208x256xf32> to vector<208x128xf32>
    %23 = vector.extract_strided_slice %21 {offsets = [0, 128], sizes = [208, 128], strides = [1, 1]} : vector<208x256xf32> to vector<208x128xf32>
    %cst_17 = arith.constant -2.000000e+01 : f32
    %cst_18 = arith.constant 2.000000e+00 : f32
    %24 = vector.broadcast %cst_17 : f32 to vector<208x128xf32>
    %25 = arith.maximumf %24, %23 : vector<208x128xf32>
    %26 = vector.broadcast %cst_18 : f32 to vector<208x128xf32>
    %27 = arith.minimumf %26, %25 : vector<208x128xf32>
    %28 = math.exp %27 : vector<208x128xf32>
    %c0_19 = arith.constant 0 : index
    %c0_20 = arith.constant 0 : index
    %29 = vector.load %arg2[%c0_19, %c0_20] : memref<208x128xf32, #tpu.memory_space<vmem>>, vector<208x128xf32>
    %30 = arith.mulf %28, %29 : vector<208x128xf32>
    %31 = arith.addf %22, %30 : vector<208x128xf32>
    %32 = math.tanh %31 : vector<208x128xf32>
    %cst_21 = arith.constant -5.000000e-01 : f32
    %33 = vector.broadcast %cst_21 : f32 to vector<208x128xf32>
    %34 = arith.mulf %33, %29 : vector<208x128xf32>
    %35 = arith.mulf %34, %29 : vector<208x128xf32>
    %36 = arith.subf %35, %27 : vector<208x128xf32>
    %cst_22 = arith.constant 0.918938517 : f32
    %37 = vector.broadcast %cst_22 : f32 to vector<208x128xf32>
    %38 = arith.subf %36, %37 : vector<208x128xf32>
    %cst_23 = arith.constant -2.000000e+00 : f32
    %39 = vector.broadcast %cst_23 : f32 to vector<208x128xf32>
    %40 = arith.mulf %39, %31 : vector<208x128xf32>
    %cst_24 = arith.constant 0.000000e+00 : f32
    %41 = vector.broadcast %cst_24 : f32 to vector<208x128xf32>
    %42 = arith.maximumf %40, %41 : vector<208x128xf32>
    %43 = math.absf %40 : vector<208x128xf32>
    %cst_25 = arith.constant 0.000000e+00 : f32
    %44 = vector.broadcast %cst_25 : f32 to vector<208x128xf32>
    %45 = arith.subf %44, %43 : vector<208x128xf32>
    %46 = math.exp %45 : vector<208x128xf32>
    %47 = math.log1p %46 : vector<208x128xf32>
    %48 = arith.addf %42, %47 : vector<208x128xf32>
    %cst_26 = arith.constant 0.693147182 : f32
    %49 = vector.broadcast %cst_26 : f32 to vector<208x128xf32>
    %50 = arith.subf %49, %31 : vector<208x128xf32>
    %51 = arith.subf %50, %48 : vector<208x128xf32>
    %cst_27 = arith.constant 2.000000e+00 : f32
    %52 = vector.broadcast %cst_27 : f32 to vector<208x128xf32>
    %53 = arith.mulf %52, %51 : vector<208x128xf32>
    %54 = arith.subf %38, %53 : vector<208x128xf32>
    %55 = tpu.iota {dimensions = array<i32: 1>} : vector<208x128xi32>
    %c6_i32 = arith.constant 6 : i32
    %56 = vector.broadcast %c6_i32 : i32 to vector<208x128xi32>
    %57 = arith.cmpi slt, %55, %56 : vector<208x128xi32>
    %cst_28 = arith.constant 0.000000e+00 : f32
    %58 = vector.broadcast %cst_28 : f32 to vector<208x128xf32>
    %59 = arith.select %57, %54, %58 : vector<208x128xi1>, vector<208x128xf32>
    %cst_29 = arith.constant dense<0.000000e+00> : vector<208xf32>
    %60 = vector.multi_reduction <add>, %59, %cst_29 [1] : vector<208x128xf32> to vector<208xf32>
    %61 = vector.shape_cast %60 : vector<208xf32> to vector<208x1xf32>
    %c0_30 = arith.constant 0 : index
    %c0_31 = arith.constant 0 : index
    %62 = vector.load %arg9[%c0_30, %c0_31] : memref<208x256xf32, #tpu.memory_space<vmem>>, vector<208x128xf32>
    tpu.vector_store %arg9[%c0_30, %c0_31], %32 {strides = array<i32>} : memref<208x256xf32, #tpu.memory_space<vmem>>, vector<208x128xf32>,
    %63 = vector.shape_cast %61 : vector<208x1xf32> to vector<208x1xf32>
    %64 = vector.broadcast %63 : vector<208x1xf32> to vector<208x128xf32>
    %c0_32 = arith.constant 0 : index
    %c128 = arith.constant 128 : index
    %65 = vector.load %arg9[%c0_32, %c128] : memref<208x256xf32, #tpu.memory_space<vmem>>, vector<208x128xf32>
    tpu.vector_store %arg9[%c0_32, %c128], %64 {strides = array<i32>} : memref<208x256xf32, #tpu.memory_space<vmem>>, vector<208x128xf32>,
    return
  }
  func.func @transform_0(%arg0: i32) -> (i32, i32) {
    %c0_i32 = arith.constant 0 : i32
    %c0_i32_0 = arith.constant 0 : i32
    return %arg0, %c0_i32 : i32, i32
  }
  func.func @transform_1(%arg0: i32) -> (i32, i32) {
    %c0_i32 = arith.constant 0 : i32
    %c0_i32_0 = arith.constant 0 : i32
    return %arg0, %c0_i32 : i32, i32
  }
  func.func @transform_2(%arg0: i32) -> (i32, i32) {
    %c0_i32 = arith.constant 0 : i32
    %c0_i32_0 = arith.constant 0 : i32
    %c0_i32_1 = arith.constant 0 : i32
    return %c0_i32, %c0_i32_0 : i32, i32
  }
  func.func @transform_3(%arg0: i32) -> (i32, i32) {
    %c0_i32 = arith.constant 0 : i32
    %c0_i32_0 = arith.constant 0 : i32
    %c0_i32_1 = arith.constant 0 : i32
    return %c0_i32, %c0_i32_0 : i32, i32
  }
  func.func @transform_4(%arg0: i32) -> (i32, i32) {
    %c0_i32 = arith.constant 0 : i32
    %c0_i32_0 = arith.constant 0 : i32
    %c0_i32_1 = arith.constant 0 : i32
    return %c0_i32, %c0_i32_0 : i32, i32
  }
  func.func @transform_5(%arg0: i32) -> (i32, i32) {
    %c0_i32 = arith.constant 0 : i32
    %c0_i32_0 = arith.constant 0 : i32
    %c0_i32_1 = arith.constant 0 : i32
    return %c0_i32, %c0_i32_0 : i32, i32
  }
  func.func @transform_6(%arg0: i32) -> (i32, i32) {
    %c0_i32 = arith.constant 0 : i32
    %c0_i32_0 = arith.constant 0 : i32
    %c0_i32_1 = arith.constant 0 : i32
    return %c0_i32, %c0_i32_0 : i32, i32
  }
  func.func @transform_7(%arg0: i32) -> (i32, i32) {
    %c0_i32 = arith.constant 0 : i32
    %c0_i32_0 = arith.constant 0 : i32
    %c0_i32_1 = arith.constant 0 : i32
    return %c0_i32, %c0_i32_0 : i32, i32
  }
  func.func @transform_8(%arg0: i32) -> (i32, i32) {
    %c0_i32 = arith.constant 0 : i32
    %c0_i32_0 = arith.constant 0 : i32
    return %arg0, %c0_i32 : i32, i32
  }
}

</mosaic_0001>

<bundles_post_ra>
// kernel: tpu_custom_call.1
= control target key start
LH: loop header
LB: loop body
LE: loop exit
PB: predicated region body
PF: predicated region fallthrough
CT: control target
= control target key end

     0   :  { %13 = vsyncpa [#allocation3], 0  ;;  %s4318_s0 = inlined_call_operand.vmem [shape: bf16[208,32], index: 0, kind: input, shape index: {}]   ;;  %s4319_s1 = inlined_call_operand.hbm [shape: f32[208,128], index: 1, kind: input, shape index: {}]   ;;  %s4320_s2 = inlined_call_operand.vmem [shape: bf16[32,256], index: 2, kind: input, shape index: {}]   ;;  %s4321_s3 = inlined_call_operand.vmem [shape: f32[1,256], index: 3, kind: input, shape index: {}]   ;;  %s4322_s4 = inlined_call_operand.hbm [shape: bf16[256,256], index: 4, kind: input, shape index: {}]   ;;  %s4323_s5 = inlined_call_operand.vmem [shape: f32[1,256], index: 5, kind: input, shape index: {}]   ;;  %s4324_s6 = inlined_call_operand.hbm [shape: bf16[256,256], index: 6, kind: input, shape index: {}]   ;;  %s4325_s7 = inlined_call_operand.vmem [shape: f32[1,256], index: 7, kind: input, shape index: {}]   ;;  %s4326_s8 = inlined_call_operand.hbm [shape: f32[208,256], index: 8, kind: output, shape index: {}]  }
   0x1   :  { %14 = vsyncpa [#allocation6], 0 }
   0x2   :  { %15 = vsyncpa [#allocation4], 0  ;;  %s2825_s27 = smov [#allocation5]   ;;  %s2826_s29 = smov [#allocation2]  }
   0x3   :  { %s39_s28 = sshll.u32 %s2825_s27, 4  ;;  %s23_s30 = sshll.u32 %s2826_s29, 4  ;;  %s40_s28 = int_to_ptr.vmem [resolvable:$true] %s39_s28  ;;  %s2879_s30 = int_to_ptr.vmem [resolvable:$true] %s23_s30 }
   0x4   :  { %s2731_s11 = scalar_lea.hbm %s4322_s4, 4096 }
   0x5   :  { %p2732_p0 = scmp.ne.s32.totalorder %s4322_s4, %s2731_s11  ;;  %p2735_p1 = scmp.lt.u32.totalorder %s2731_s11, %s4322_s4 }
   0x7   :  { %p2737_p2 = pnand %p2735_p1, %p2732_p0 }
   0x9   :  { %2740 = shalt.err (!%p2737_p2)
}
   0xa   :  { %s2741_s16 = scalar_lea.vmem %s40_s28, 4096  ;;  %p2746_p4 = scmp.lt.s32.totalorder %s40_s28, %s40_s28 }
   0xb   :  { %p2742_p3 = scmp.ne.s32.totalorder %s40_s28, %s2741_s16  ;;  %p2747_p5 = scmp.lt.s32.totalorder %s2741_s16, %s2741_s16 }
   0xd   :  { %p2748_p6 = por %p2747_p5, %p2746_p4 }
   0xf   :  { %p2749_p7 = pnand %p2748_p6, %p2742_p3 }
  0x11   :  { %2752 = shalt.err (!%p2749_p7)
}
  0x12   :  { %s2827_s17 = smov 128   ;;  %s2828_s18 = smov 8  }
  0x13   :  { %45 = dma.hbm_to_vmem [thread:$0]  %s4322_s4, 4096, %s40_s28, [#allocation6], %s2827_s17, %s2827_s17, %s2828_s18  }
  0x14   :  { %s2753_s23 = scalar_lea.hbm %s4319_s1, 3328 }
  0x15   :  { %p2754_p8 = scmp.ne.s32.totalorder %s4319_s1, %s2753_s23  ;;  %p2757_p9 = scmp.lt.u32.totalorder %s2753_s23, %s4319_s1 }
  0x17   :  { %p2759_p10 = pnand %p2757_p9, %p2754_p8 }
  0x19   :  { %2762 = shalt.err (!%p2759_p10)
}
  0x1a   :  { %s2763_s29 = scalar_lea.vmem %s2879_s30, 3328  ;;  %p2768_p12 = scmp.lt.s32.totalorder %s2879_s30, %s2879_s30 }
  0x1b   :  { %p2764_p11 = scmp.ne.s32.totalorder %s2879_s30, %s2763_s29  ;;  %p2769_p13 = scmp.lt.s32.totalorder %s2763_s29, %s2763_s29 }
  0x1d   :  { %p2770_p0 = por %p2769_p13, %p2768_p12 }
  0x1f   :  { %p2771_p1 = pnand %p2770_p0, %p2764_p11 }
  0x21   :  { %2774 = shalt.err (!%p2771_p1)
}
  0x22   :  { %29 = dma.hbm_to_vmem [thread:$0]  %s4319_s1, 3328, %s2879_s30, [#allocation3], %s2827_s17, %s2827_s17, %s2828_s18  }
  0x23   :  { %s2829_s9 = smov [#allocation7]   ;;  %s2775_s13 = scalar_lea.hbm %s4324_s6, 4096 }
  0x24   :  { %s53_s10 = sshll.u32 %s2829_s9, 4  ;;  %p2776_p2 = scmp.ne.s32.totalorder %s4324_s6, %s2775_s13  ;;  %s54_s10 = int_to_ptr.vmem [resolvable:$true] %s53_s10 }
  0x25   :  { %p2779_p3 = scmp.lt.u32.totalorder %s2775_s13, %s4324_s6 }
  0x27   :  { %p2781_p4 = pnand %p2779_p3, %p2776_p2 }
  0x29   :  { %2784 = shalt.err (!%p2781_p4)
}
  0x2a   :  { %s2785_s20 = scalar_lea.vmem %s54_s10, 4096  ;;  %p2790_p6 = scmp.lt.s32.totalorder %s54_s10, %s54_s10 }
  0x2b   :  { %p2786_p5 = scmp.ne.s32.totalorder %s54_s10, %s2785_s20  ;;  %p2791_p7 = scmp.lt.s32.totalorder %s2785_s20, %s2785_s20 }
  0x2d   :  { %p2792_p8 = por %p2791_p7, %p2790_p6 }
  0x2f   :  { %p2793_p9 = pnand %p2792_p8, %p2786_p5 }
  0x31   :  { %2796 = shalt.err (!%p2793_p9)
}
  0x32   :  { %59 = dma.hbm_to_vmem [thread:$0]  %s4324_s6, 4096, %s54_s10, [#allocation6], %s2827_s17, %s2827_s17, %s2828_s18  }
  0x33   :  { %2819 = dma.done.wait [#allocation3], 3328  }
  0x34   :  { %2820 = vsyncadd [#allocation3], 4294963968 }
  0x35   :  { %2821 = dma.done.wait [#allocation6], 8192  }
  0x36   :  { %2822 = vsyncadd [#allocation6], 4294959104  ;;  %v2830_v0 = vmov 0   ;;  %v2408_v1 = vld [vmem:[%s4320_s2 + $0x4] ss:$8 sps:$4 sm:$0xff]   ;;  %vm199_vm0 = vcmask 261120   ;;  %v104_v55 = vlaneseq }
  0x37   :  { %271 = vmatprep.mubr.bf16.mxu0 %v2830_v0  ;;  %351 = vmatprep.mubr.bf16.mxu1 %v2830_v0  ;;  %v2410_v2 = vld [vmem:[%s4320_s2] ss:$8 sps:$4 sm:$0xff]   ;;  %v2411_v3 = vld [vmem:[%s4320_s2 + $0x14] ss:$8 sps:$4 sm:$0xff]   ;;  %v2413_v4 = vld [vmem:[%s4320_s2 + $0x10] ss:$8 sps:$4 sm:$0xff]  }
  0x38   :  { %239 = vmatprep.subr.bf16.mxu0 %v2408_v1  ;;  %2395 = vmatprep.subr.bf16.mxu1 %v2408_v1  ;;  %v2414_v5 = vld [vmem:[%s4318_s0] sm:$0xff]   ;;  %v2415_v7 = vld [vmem:[%s4318_s0 + $0x8] sm:$0xff]   ;;  %v2427_v8 = vld [vmem:[#allocation5] ss:$8 sps:$4 sm:$0xff]   ;;  %v105_v58 = vshrl.u32 %v104_v55, 7 }
  0x39   :  { %240 = vmatpush1.bf16.msra.mxu0 %v2410_v2  ;;  %2397 = vmatpush1.bf16.msra.mxu1 %v2410_v2  ;;  %v2422_v6 = vld [vmem:[%s4318_s0 + $0x40] sm:$0xff]   ;;  %v2429_v9 = vld [vmem:[#allocation5 + $0x4] ss:$8 sps:$4 sm:$0xff]   ;;  %v2423_v10 = vld [vmem:[%s4318_s0 + $0x48] sm:$0xff]  }
  0x3a   :  { %241 = vmatprep.subr.bf16.mxu0 %v2411_v3  ;;  %2396 = vmatprep.subr.bf16.mxu1 %v2411_v3  ;;  %v2432_v11 = vld [vmem:[#allocation5 + $0x14] ss:$8 sps:$4 sm:$0xff]   ;;  %v2430_v12 = vld [vmem:[#allocation5 + $0x10] ss:$8 sps:$4 sm:$0xff]   ;;  %v2435_v13 = vld [vmem:[#allocation5 + $0x24] ss:$8 sps:$4 sm:$0xff]  }
  0x3b   :  { %v2416_v14 = vld [vmem:[%s4318_s0 + $0x10] sm:$0xff]   ;;  %v2438_v16 = vld [vmem:[#allocation5 + $0x34] ss:$8 sps:$4 sm:$0xff]   ;;  %v2436_v18 = vld [vmem:[#allocation5 + $0x30] ss:$8 sps:$4 sm:$0xff]   ;;  %v3009_v61 = vsub.s32 0, %v105_v58 }
  0x3c   :  { %v2433_v15 = vld [vmem:[#allocation5 + $0x20] ss:$8 sps:$4 sm:$0xff]   ;;  %v2441_v19 = vld [vmem:[#allocation5 + $0x44] ss:$8 sps:$4 sm:$0xff]   ;;  %v2444_v22 = vld [vmem:[#allocation5 + $0x54] ss:$8 sps:$4 sm:$0xff]  }
  0x3d   :  { %242 = vmatpush1.bf16.msra.mxu0 %v2413_v4  ;;  %2398 = vmatpush1.bf16.msra.mxu1 %v2413_v4  ;;  %v2424_v17 = vld [vmem:[%s4318_s0 + $0x50] sm:$0xff]   ;;  %v2417_v20 = vld [vmem:[%s4318_s0 + $0x18] sm:$0xff]   ;;  %v2442_v24 = vld [vmem:[#allocation5 + $0x50] ss:$8 sps:$4 sm:$0xff]   ;;  %v3014_v63 = vsub.s32 1, %v105_v58 }
  0x3e   :  { %684 = vmatprep.subr.bf16.mxu1 %v2429_v9  ;;  %v2439_v21 = vld [vmem:[#allocation5 + $0x40] ss:$8 sps:$4 sm:$0xff]   ;;  %v2447_v25 = vld [vmem:[#allocation5 + $0x64] ss:$8 sps:$4 sm:$0xff]   ;;  %v2418_v26 = vld [vmem:[%s4318_s0 + $0x20] sm:$0xff]  }
  0x3f   :  { %v2425_v23 = vld [vmem:[%s4318_s0 + $0x58] sm:$0xff]   ;;  %v2450_v28 = vld [vmem:[#allocation5 + $0x74] ss:$8 sps:$4 sm:$0xff]   ;;  %v2448_v30 = vld [vmem:[#allocation5 + $0x70] ss:$8 sps:$4 sm:$0xff]  }
  0x40   :  { %2292 = vmatmul.mubr.msk.bf16.vlgmr.msra.gmra.mrb[0].mxu0 %vm199_vm0, %v2414_v5  ;;  %2300 = vmatmul.mubr.msk.bf16.vlgmr.msra.gmra.mrb[0].mxu1 %vm199_vm0, %v2422_v6  ;;  %v2445_v27 = vld [vmem:[#allocation5 + $0x60] ss:$8 sps:$4 sm:$0xff]   ;;  %v2426_v29 = vld [vmem:[%s4318_s0 + $0x60] sm:$0xff]   ;;  %v2453_v31 = vld [vmem:[#allocation5 + $0x84] ss:$8 sps:$4 sm:$0xff]  }
  0x41   :  { %281 = vmatprep.mubr.bf16.mxu0 %v2830_v0  ;;  %361 = vmatprep.mubr.bf16.mxu1 %v2830_v0  ;;  %v2419_v32 = vld [vmem:[%s4318_s0 + $0x28] sm:$0xff]   ;;  %v2451_v33 = vld [vmem:[#allocation5 + $0x80] ss:$8 sps:$4 sm:$0xff]   ;;  %v2459_v36 = vld [vmem:[#allocation5 + $0xa4] ss:$8 sps:$4 sm:$0xff]  }
  0x42   :  { %685 = vmatpush1.bf16.msra.mxu1 %v2427_v8  ;;  %v2456_v34 = vld [vmem:[#allocation5 + $0x94] ss:$8 sps:$4 sm:$0xff]   ;;  %v2454_v35 = vld [vmem:[#allocation5 + $0x90] ss:$8 sps:$4 sm:$0xff]   ;;  %v2420_v37 = vld [vmem:[%s4318_s0 + $0x30] sm:$0xff]  }
  0x43   :  { %686 = vmatprep.subr.bf16.mxu1 %v2432_v11  ;;  %v2457_v38 = vld [vmem:[#allocation5 + $0xa0] ss:$8 sps:$4 sm:$0xff]   ;;  %v2462_v39 = vld [vmem:[#allocation5 + $0xb4] ss:$8 sps:$4 sm:$0xff]   ;;  %v2460_v40 = vld [vmem:[#allocation5 + $0xb0] ss:$8 sps:$4 sm:$0xff]  }
  0x44   :  { %v2465_v41 = vld [vmem:[#allocation5 + $0xc4] ss:$8 sps:$4 sm:$0xff]   ;;  %v2463_v43 = vld [vmem:[#allocation5 + $0xc0] ss:$8 sps:$4 sm:$0xff]   ;;  %v2468_v44 = vld [vmem:[#allocation5 + $0xd4] ss:$8 sps:$4 sm:$0xff]  }
  0x45   :  { %v2421_v42 = vld [vmem:[%s4318_s0 + $0x38] sm:$0xff]   ;;  %v2466_v45 = vld [vmem:[#allocation5 + $0xd0] ss:$8 sps:$4 sm:$0xff]   ;;  %v2474_v48 = vld [vmem:[#allocation5 + $0xf4] ss:$8 sps:$4 sm:$0xff]  }
  0x46   :  { %687 = vmatpush1.bf16.msra.mxu1 %v2430_v12  ;;  %v2471_v46 = vld [vmem:[#allocation5 + $0xe4] ss:$8 sps:$4 sm:$0xff]   ;;  %v2469_v47 = vld [vmem:[#allocation5 + $0xe0] ss:$8 sps:$4 sm:$0xff]   ;;  %v2472_v49 = vld [vmem:[#allocation5 + $0xf0] ss:$8 sps:$4 sm:$0xff]  }
  0x47   :  { %688 = vmatprep.subr.bf16.mxu1 %v2435_v13  ;;  %v2475_v50 = vld [vmem:[#allocation7] ss:$8 sps:$4 sm:$0xff]   ;;  %v2477_v51 = vld [vmem:[#allocation7 + $0x4] ss:$8 sps:$4 sm:$0xff]   ;;  %v2480_v52 = vld [vmem:[#allocation7 + $0x14] ss:$8 sps:$4 sm:$0xff]  }
  0x48   :  { %2293 = vmatmul.mubr.msk.bf16.gmra.mrb[4].mxu0 %vm199_vm0, %v2415_v7  ;;  %2301 = vmatmul.mubr.msk.bf16.gmra.mrb[4].mxu1 %vm199_vm0, %v2423_v10  ;;  %v2478_v53 = vld [vmem:[#allocation7 + $0x10] ss:$8 sps:$4 sm:$0xff]   ;;  %v2483_v54 = vld [vmem:[#allocation7 + $0x24] ss:$8 sps:$4 sm:$0xff]   ;;  %v2481_v56 = vld [vmem:[#allocation7 + $0x20] ss:$8 sps:$4 sm:$0xff]  }
  0x49   :  { %291 = vmatprep.mubr.bf16.mxu0 %v2830_v0  ;;  %371 = vmatprep.mubr.bf16.mxu1 %v2830_v0  ;;  %v2486_v57 = vld [vmem:[#allocation7 + $0x34] ss:$8 sps:$4 sm:$0xff]   ;;  %v2484_v59 = vld [vmem:[#allocation7 + $0x30] ss:$8 sps:$4 sm:$0xff]   ;;  %v2489_v60 = vld [vmem:[#allocation7 + $0x44] ss:$8 sps:$4 sm:$0xff]  }
  0x4a   :  { %689 = vmatpush1.bf16.msra.mxu1 %v2433_v15  ;;  %1129 = vmatprep.subr.bf16.mxu0 %v2477_v51  ;;  %v102_v62 = vld [vmem:[%s4321_s3] sm:$0x3]  ;;  %v2492_v1 = vld [vmem:[#allocation7 + $0x54] ss:$8 sps:$4 sm:$0xff]   ;;  %v2495_v5 = vld [vmem:[#allocation7 + $0x64] ss:$8 sps:$4 sm:$0xff]  }
  0x4b   :  { %690 = vmatprep.subr.bf16.mxu1 %v2438_v16  ;;  %1130 = vmatpush1.bf16.msra.mxu0 %v2475_v50  ;;  %v3017_v2 = vrot.slane %v102_v62, %v3009_v61  ;;  %v3020_v3 = vrot.slane %v102_v62, %v3014_v63  ;;  %v2490_v4 = vld [vmem:[#allocation7 + $0x50] ss:$8 sps:$4 sm:$0xff]   ;;  %v2493_v11 = vld [vmem:[#allocation7 + $0x60] ss:$8 sps:$4 sm:$0xff]   ;;  %v2498_v15 = vld [vmem:[#allocation7 + $0x74] ss:$8 sps:$4 sm:$0xff]  }
  0x4c   :  { %1131 = vmatprep.subr.bf16.mxu0 %v2480_v52  ;;  %v2502_v62 = vld [vmem:[#allocation7 + $0x90] ss:$8 sps:$4 sm:$0xff]  }
  0x4e   :  { %691 = vmatpush1.bf16.msra.mxu1 %v2436_v18 }
  0x4f   :  { %692 = vmatprep.subr.bf16.mxu1 %v2441_v19  ;;  %1132 = vmatpush1.bf16.msra.mxu0 %v2478_v53 }
  0x50   :  { %2294 = vmatmul.mubr.msk.bf16.gmra.mrb[8].mxu0 %vm199_vm0, %v2416_v14  ;;  %2302 = vmatmul.mubr.msk.bf16.gmra.mrb[8].mxu1 %vm199_vm0, %v2424_v17 }
  0x51   :  { %301 = vmatprep.mubr.bf16.mxu0 %v2830_v0  ;;  %381 = vmatprep.mubr.bf16.mxu1 %v2830_v0 }
  0x52   :  { %693 = vmatpush1.bf16.msra.mxu1 %v2439_v21  ;;  %1133 = vmatprep.subr.bf16.mxu0 %v2483_v54 }
  0x53   :  { %694 = vmatprep.subr.bf16.mxu1 %v2444_v22  ;;  %1134 = vmatpush1.bf16.msra.mxu0 %v2481_v56 }
  0x54   :  { %1135 = vmatprep.subr.bf16.mxu0 %v2486_v57 }
  0x56   :  { %695 = vmatpush1.bf16.msra.mxu1 %v2442_v24 }
  0x57   :  { %696 = vmatprep.subr.bf16.mxu1 %v2447_v25  ;;  %1136 = vmatpush1.bf16.msra.mxu0 %v2484_v59 }
  0x58   :  { %2295 = vmatmul.mubr.msk.bf16.gmra.mrb[12].mxu0 %vm199_vm0, %v2417_v20  ;;  %2303 = vmatmul.mubr.msk.bf16.gmra.mrb[12].mxu1 %vm199_vm0, %v2425_v23 }
  0x59   :  { %311 = vmatprep.mubr.bf16.mxu0 %v2830_v0  ;;  %391 = vmatprep.mubr.bf16.mxu1 %v2830_v0 }
  0x5a   :  { %697 = vmatpush1.bf16.msra.mxu1 %v2445_v27  ;;  %1137 = vmatprep.subr.bf16.mxu0 %v2489_v60 }
  0x5b   :  { %698 = vmatprep.subr.bf16.mxu1 %v2450_v28  ;;  %v2496_v28 = vld [vmem:[#allocation7 + $0x70] ss:$8 sps:$4 sm:$0xff]  }
  0x5e   :  { %699 = vmatpush1.bf16.msra.mxu1 %v2448_v30 }
  0x5f   :  { %700 = vmatprep.subr.bf16.mxu1 %v2453_v31 }
  0x60   :  { %2296 = vmatmul.mubr.msk.bf16.gmra.mrb[16].mxu0 %vm199_vm0, %v2418_v26  ;;  %2304 = vmatmul.mubr.msk.bf16.gmra.mrb[16].mxu1 %vm199_vm0, %v2426_v29 }
  0x61   :  { %321 = vmatprep.mubr.bf16.mxu0 %v2830_v0 }
  0x62   :  { %701 = vmatpush1.bf16.msra.mxu1 %v2451_v33 }
  0x63   :  { %702 = vmatprep.subr.bf16.mxu1 %v2456_v34 }
  0x66   :  { %703 = vmatpush1.bf16.msra.mxu1 %v2454_v35 }
  0x67   :  { %704 = vmatprep.subr.bf16.mxu1 %v2459_v36 }
  0x68   :  { %2297 = vmatmul.mubr.msk.bf16.gmra.mrb[20].mxu0 %vm199_vm0, %v2419_v32  ;;  %v2501_v32 = vld [vmem:[#allocation7 + $0x84] ss:$8 sps:$4 sm:$0xff]  }
  0x69   :  { %331 = vmatprep.mubr.bf16.mxu0 %v2830_v0 }
  0x6a   :  { %705 = vmatpush1.bf16.msra.mxu1 %v2457_v38 }
  0x6b   :  { %706 = vmatprep.subr.bf16.mxu1 %v2462_v39 }
  0x6e   :  { %707 = vmatpush1.bf16.msra.mxu1 %v2460_v40 }
  0x6f   :  { %708 = vmatprep.subr.bf16.mxu1 %v2465_v41 }
  0x70   :  { %2298 = vmatmul.mubr.msk.bf16.gmra.mrb[24].mxu0 %vm199_vm0, %v2420_v37 }
  0x71   :  { %341 = vmatprep.mubr.bf16.mxu0 %v2830_v0  ;;  %v2487_v0 = vld [vmem:[#allocation7 + $0x40] ss:$8 sps:$4 sm:$0xff]  }
  0x72   :  { %709 = vmatpush1.bf16.msra.mxu1 %v2463_v43  ;;  %1138 = vmatpush1.bf16.msra.mxu0 %v2487_v0 }
  0x73   :  { %710 = vmatprep.subr.bf16.mxu1 %v2468_v44  ;;  %1139 = vmatprep.subr.bf16.mxu0 %v2492_v1 }
  0x76   :  { %711 = vmatpush1.bf16.msra.mxu1 %v2466_v45  ;;  %1140 = vmatpush1.bf16.msra.mxu0 %v2490_v4 }
  0x77   :  { %712 = vmatprep.subr.bf16.mxu1 %v2471_v46  ;;  %1141 = vmatprep.subr.bf16.mxu0 %v2495_v5  ;;  %v2507_v5 = vld [vmem:[#allocation7 + $0xa4] ss:$8 sps:$4 sm:$0xff]  }
  0x78   :  { %2299 = vmatmul.mubr.msk.bf16.gmra.mrb[28].mxu0 %vm199_vm0, %v2421_v42  ;;  %v2499_v42 = vld [vmem:[#allocation7 + $0x80] ss:$8 sps:$4 sm:$0xff]  }
  0x7a   :  { %713 = vmatpush1.bf16.msra.mxu1 %v2469_v47  ;;  %1142 = vmatpush1.bf16.msra.mxu0 %v2493_v11  ;;  %v2504_v47 = vld [vmem:[#allocation7 + $0x94] ss:$8 sps:$4 sm:$0xff]  }
  0x7b   :  { %714 = vmatprep.subr.bf16.mxu1 %v2474_v48  ;;  %1143 = vmatprep.subr.bf16.mxu0 %v2498_v15  ;;  %v2505_v15 = vld [vmem:[#allocation7 + $0xa0] ss:$8 sps:$4 sm:$0xff]  }
  0x7e   :  { %715 = vmatpush1.bf16.msra.mxu1 %v2472_v49  ;;  %1144 = vmatpush1.bf16.msra.mxu0 %v2496_v28 }
  0x7f   :  { %1145 = vmatprep.subr.bf16.mxu0 %v2501_v32 }
  0x82   :  { %1146 = vmatpush1.bf16.msra.mxu0 %v2499_v42 }
  0x83   :  { %1147 = vmatprep.subr.bf16.mxu0 %v2504_v47 }
  0x86   :  { %1148 = vmatpush1.bf16.msra.mxu0 %v2502_v62 }
  0x87   :  { %1149 = vmatprep.subr.bf16.mxu0 %v2507_v5 }
  0x8a   :  { %1150 = vmatpush1.bf16.msra.mxu0 %v2505_v15 }
 0x113   :  { %v273_v6 = vpop.f32.mrb[0].mxu0  ;;  %v353_v14 = vpop.f32.mrb[0].mxu1 }
 0x114   :  { %v274_v7 = vadd.f32 %v273_v6, %v3017_v2  ;;  %v275_v8 = vpop.f32.mrb[1].mxu0  ;;  %v354_v17 = vadd.f32 %v353_v14, %v3017_v2  ;;  %v355_v18 = vpop.f32.mrb[1].mxu1 }
 0x115   :  { %v276_v9 = vadd.f32 %v275_v8, %v3020_v3  ;;  %v277_v10 = vpop.f32.mrb[2].mxu0  ;;  %v356_v21 = vadd.f32 %v355_v18, %v3020_v3  ;;  %v357_v22 = vpop.f32.mrb[2].mxu1 }
 0x116   :  { %v278_v12 = vadd.f32 %v277_v10, %v3017_v2  ;;  %v279_v13 = vpop.f32.mrb[3].mxu0  ;;  %v402_v19 = vmax.f32 %v274_v7, 0.0  ;;  %v434_v25 = vmax.f32 %v354_v17, 0.0  ;;  %v358_v26 = vadd.f32 %v357_v22, %v3017_v2  ;;  %v359_v27 = vpop.f32.mrb[3].mxu1 }
 0x117   :  { %v280_v16 = vadd.f32 %v279_v13, %v3020_v3  ;;  %v403_v23 = vmax.f32 %v276_v9, 0.0  ;;  %v435_v30 = vmax.f32 %v356_v21, 0.0  ;;  %v360_v31 = vadd.f32 %v359_v27, %v3020_v3 }
 0x118   :  { %v404_v20 = vmax.f32 %v278_v12, 0.0  ;;  %v436_v35 = vmax.f32 %v358_v26, 0.0 }
 0x119   :  { %v405_v24 = vmax.f32 %v280_v16, 0.0  ;;  %v437_v38 = vmax.f32 %v360_v31, 0.0 }
 0x11a   :  { %v454_v29 = vpack.c.bf16 %v404_v20, %v402_v19  ;;  %v3032_v41 = vpack.c.bf16 %v436_v35, %v434_v25  ;;  %v2510_v20 = vld [vmem:[#allocation7 + $0xb4] ss:$8 sps:$4 sm:$0xff]  }
 0x11b   :  { %v455_v33 = vpack.c.bf16 %v405_v24, %v403_v23  ;;  %v283_v34 = vpop.f32.mrb[4].mxu0  ;;  %v3035_v45 = vpack.c.bf16 %v437_v38, %v435_v30  ;;  %v363_v46 = vpop.f32.mrb[4].mxu1  ;;  %1151 = vmatprep.subr.bf16.mxu0 %v2510_v20 }
 0x11c   :  { %v284_v36 = vadd.f32 %v283_v34, %v3017_v2  ;;  %v285_v37 = vpop.f32.mrb[5].mxu0  ;;  %v364_v49 = vadd.f32 %v363_v46, %v3017_v2  ;;  %v365_v50 = vpop.f32.mrb[5].mxu1 }
 0x11d   :  { %v286_v39 = vadd.f32 %v285_v37, %v3020_v3  ;;  %v287_v40 = vpop.f32.mrb[6].mxu0  ;;  %716 = vmatprep.mubr.bf16.mxu1 %v455_v33  ;;  %v366_v53 = vadd.f32 %v365_v50, %v3020_v3  ;;  %v367_v54 = vpop.f32.mrb[6].mxu1  ;;  %v2508_v33 = vld [vmem:[#allocation7 + $0xb0] ss:$8 sps:$4 sm:$0xff]   ;;  %v2513_v37 = vld [vmem:[#allocation7 + $0xc4] ss:$8 sps:$4 sm:$0xff]  }
 0x11e   :  { %v288_v43 = vadd.f32 %v287_v40, %v3017_v2  ;;  %v289_v44 = vpop.f32.mrb[7].mxu0  ;;  %717 = vmatmul.mubr.bf16.vlgmr.msra.gmra.mrb[20].mxu1 %v454_v29  ;;  %v406_v51 = vmax.f32 %v284_v36, 0.0  ;;  %v438_v58 = vmax.f32 %v364_v49, 0.0  ;;  %v368_v59 = vadd.f32 %v367_v54, %v3017_v2  ;;  %v369_v60 = vpop.f32.mrb[7].mxu1  ;;  %1152 = vmatpush1.bf16.msra.mxu0 %v2508_v33  ;;  %v2511_v49 = vld [vmem:[#allocation7 + $0xc0] ss:$8 sps:$4 sm:$0xff]  }
 0x11f   :  { %v290_v48 = vadd.f32 %v289_v44, %v3020_v3  ;;  %v407_v56 = vmax.f32 %v286_v39, 0.0  ;;  %v439_v1 = vmax.f32 %v366_v53, 0.0  ;;  %v370_v4 = vadd.f32 %v369_v60, %v3020_v3  ;;  %1153 = vmatprep.subr.bf16.mxu0 %v2513_v37  ;;  %v2516_v54 = vld [vmem:[#allocation7 + $0xd4] ss:$8 sps:$4 sm:$0xff]  }
 0x120   :  { %v408_v52 = vmax.f32 %v288_v43, 0.0  ;;  %v440_v8 = vmax.f32 %v368_v59, 0.0 }
 0x121   :  { %v409_v57 = vmax.f32 %v290_v48, 0.0  ;;  %v441_v11 = vmax.f32 %v370_v4, 0.0 }
 0x122   :  { %v456_v0 = vpack.c.bf16 %v408_v52, %v406_v51  ;;  %v3044_v14 = vpack.c.bf16 %v440_v8, %v438_v58  ;;  %1154 = vmatpush1.bf16.msra.mxu0 %v2511_v49  ;;  %v2514_v8 = vld [vmem:[#allocation7 + $0xd0] ss:$8 sps:$4 sm:$0xff]  }
 0x123   :  { %v457_v6 = vpack.c.bf16 %v409_v57, %v407_v56  ;;  %v293_v7 = vpop.f32.mrb[8].mxu0  ;;  %v3047_v18 = vpack.c.bf16 %v441_v11, %v439_v1  ;;  %v373_v19 = vpop.f32.mrb[8].mxu1  ;;  %1155 = vmatprep.subr.bf16.mxu0 %v2516_v54 }
 0x124   :  { %v294_v9 = vadd.f32 %v293_v7, %v3017_v2  ;;  %v295_v10 = vpop.f32.mrb[9].mxu0  ;;  %v374_v22 = vadd.f32 %v373_v19, %v3017_v2  ;;  %v375_v23 = vpop.f32.mrb[9].mxu1 }
 0x125   :  { %v296_v12 = vadd.f32 %v295_v10, %v3020_v3  ;;  %v297_v13 = vpop.f32.mrb[10].mxu0  ;;  %726 = vmatprep.mubr.bf16.mxu1 %v457_v6  ;;  %v376_v26 = vadd.f32 %v375_v23, %v3020_v3  ;;  %v377_v27 = vpop.f32.mrb[10].mxu1 }
 0x126   :  { %v298_v16 = vadd.f32 %v297_v13, %v3017_v2  ;;  %v299_v17 = vpop.f32.mrb[11].mxu0  ;;  %727 = vmatmul.mubr.bf16.gmra.mrb[24].mxu1 %v456_v0  ;;  %v410_v24 = vmax.f32 %v294_v9, 0.0  ;;  %v442_v30 = vmax.f32 %v374_v22, 0.0  ;;  %v378_v31 = vadd.f32 %v377_v27, %v3017_v2  ;;  %v379_v32 = vpop.f32.mrb[11].mxu1  ;;  %1156 = vmatpush1.bf16.msra.mxu0 %v2514_v8 }
 0x127   :  { %v300_v21 = vadd.f32 %v299_v17, %v3020_v3  ;;  %v411_v28 = vmax.f32 %v296_v12, 0.0  ;;  %v443_v35 = vmax.f32 %v376_v26, 0.0  ;;  %v380_v36 = vadd.f32 %v379_v32, %v3020_v3 }
 0x128   :  { %v412_v25 = vmax.f32 %v298_v16, 0.0  ;;  %v444_v40 = vmax.f32 %v378_v31, 0.0 }
 0x129   :  { %v413_v29 = vmax.f32 %v300_v21, 0.0  ;;  %v445_v44 = vmax.f32 %v380_v36, 0.0 }
 0x12a   :  { %v458_v34 = vpack.c.bf16 %v412_v25, %v410_v24  ;;  %v3056_v48 = vpack.c.bf16 %v444_v40, %v442_v30 }
 0x12b   :  { %v459_v38 = vpack.c.bf16 %v413_v29, %v411_v28  ;;  %v303_v39 = vpop.f32.mrb[12].mxu0  ;;  %v3059_v52 = vpack.c.bf16 %v445_v44, %v443_v35  ;;  %v383_v53 = vpop.f32.mrb[12].mxu1 }
 0x12c   :  { %v304_v42 = vadd.f32 %v303_v39, %v3017_v2  ;;  %v305_v43 = vpop.f32.mrb[13].mxu0  ;;  %v384_v57 = vadd.f32 %v383_v53, %v3017_v2  ;;  %v385_v58 = vpop.f32.mrb[13].mxu1 }
 0x12d   :  { %v306_v46 = vadd.f32 %v305_v43, %v3020_v3  ;;  %v307_v47 = vpop.f32.mrb[14].mxu0  ;;  %736 = vmatprep.mubr.bf16.mxu1 %v459_v38  ;;  %v386_v62 = vadd.f32 %v385_v58, %v3020_v3  ;;  %v387_v0 = vpop.f32.mrb[14].mxu1 }
 0x12e   :  { %v308_v50 = vadd.f32 %v307_v47, %v3017_v2  ;;  %v309_v51 = vpop.f32.mrb[15].mxu0  ;;  %737 = vmatmul.mubr.bf16.gmra.mrb[28].mxu1 %v458_v34  ;;  %v414_v59 = vmax.f32 %v304_v42, 0.0  ;;  %v446_v5 = vmax.f32 %v384_v57, 0.0  ;;  %v388_v6 = vadd.f32 %v387_v0, %v3017_v2  ;;  %v389_v7 = vpop.f32.mrb[15].mxu1 }
 0x12f   :  { %v310_v56 = vadd.f32 %v309_v51, %v3020_v3  ;;  %v415_v1 = vmax.f32 %v306_v46, 0.0  ;;  %v447_v10 = vmax.f32 %v386_v62, 0.0  ;;  %v390_v11 = vadd.f32 %v389_v7, %v3020_v3 }
 0x130   :  { %v416_v60 = vmax.f32 %v308_v50, 0.0  ;;  %v448_v15 = vmax.f32 %v388_v6, 0.0 }
 0x131   :  { %v417_v4 = vmax.f32 %v310_v56, 0.0  ;;  %v449_v19 = vmax.f32 %v390_v11, 0.0 }
 0x132   :  { %v460_v9 = vpack.c.bf16 %v416_v60, %v414_v59  ;;  %v3068_v22 = vpack.c.bf16 %v448_v15, %v446_v5 }
 0x133   :  { %v461_v12 = vpack.c.bf16 %v417_v4, %v415_v1  ;;  %v313_v13 = vpop.f32.mrb[16].mxu0  ;;  %v3071_v25 = vpack.c.bf16 %v449_v19, %v447_v10  ;;  %v393_v26 = vpop.f32.mrb[16].mxu1 }
 0x134   :  { %v314_v16 = vadd.f32 %v313_v13, %v3017_v2  ;;  %v315_v17 = vpop.f32.mrb[17].mxu0  ;;  %v394_v28 = vadd.f32 %v393_v26, %v3017_v2  ;;  %v395_v29 = vpop.f32.mrb[17].mxu1 }
 0x135   :  { %v316_v20 = vadd.f32 %v315_v17, %v3020_v3  ;;  %v317_v21 = vpop.f32.mrb[18].mxu0  ;;  %746 = vmatprep.mubr.bf16.mxu1 %v461_v12  ;;  %v396_v32 = vadd.f32 %v395_v29, %v3020_v3  ;;  %v397_v33 = vpop.f32.mrb[18].mxu1 }
 0x136   :  { %v318_v23 = vadd.f32 %v317_v21, %v3017_v2  ;;  %v319_v24 = vpop.f32.mrb[19].mxu0  ;;  %747 = vmatmul.mubr.bf16.gmra.mrb[32].mxu1 %v460_v9  ;;  %v418_v30 = vmax.f32 %v314_v16, 0.0  ;;  %v450_v36 = vmax.f32 %v394_v28, 0.0  ;;  %v398_v37 = vadd.f32 %v397_v33, %v3017_v2  ;;  %v399_v38 = vpop.f32.mrb[19].mxu1 }
 0x137   :  { %v320_v27 = vadd.f32 %v319_v24, %v3020_v3  ;;  %v419_v34 = vmax.f32 %v316_v20, 0.0  ;;  %v451_v40 = vmax.f32 %v396_v32, 0.0  ;;  %v400_v42 = vadd.f32 %v399_v38, %v3020_v3  ;;  %v2522_v38 = vld [vmem:[#allocation7 + $0xf4] ss:$8 sps:$4 sm:$0xff]  }
 0x138   :  { %v420_v31 = vmax.f32 %v318_v23, 0.0  ;;  %v452_v46 = vmax.f32 %v398_v37, 0.0 }
 0x139   :  { %v421_v35 = vmax.f32 %v320_v27, 0.0  ;;  %v453_v50 = vmax.f32 %v400_v42, 0.0 }
 0x13a   :  { %v462_v39 = vpack.c.bf16 %v420_v31, %v418_v30  ;;  %v478_v54 = vpack.c.bf16 %v452_v46, %v450_v36 }
 0x13b   :  { %v463_v43 = vpack.c.bf16 %v421_v35, %v419_v34  ;;  %v323_v44 = vpop.f32.mrb[20].mxu0  ;;  %v479_v58 = vpack.c.bf16 %v453_v50, %v451_v40 }
 0x13c   :  { %v324_v47 = vadd.f32 %v323_v44, %v3017_v2  ;;  %v325_v49 = vpop.f32.mrb[21].mxu0 }
 0x13d   :  { %v326_v51 = vadd.f32 %v325_v49, %v3020_v3  ;;  %v327_v53 = vpop.f32.mrb[22].mxu0  ;;  %756 = vmatprep.mubr.bf16.mxu1 %v463_v43 }
 0x13e   :  { %v328_v56 = vadd.f32 %v327_v53, %v3017_v2  ;;  %v329_v57 = vpop.f32.mrb[23].mxu0  ;;  %757 = vmatmul.mubr.bf16.gmra.mrb[36].mxu1 %v462_v39  ;;  %v422_v60 = vmax.f32 %v324_v47, 0.0 }
 0x13f   :  { %v330_v59 = vadd.f32 %v329_v57, %v3020_v3  ;;  %v423_v0 = vmax.f32 %v326_v51, 0.0 }
 0x140   :  { %v424_v62 = vmax.f32 %v328_v56, 0.0 }
 0x141   :  { %v425_v1 = vmax.f32 %v330_v59, 0.0 }
 0x142   :  { %v464_v4 = vpack.c.bf16 %v424_v62, %v422_v60 }
 0x143   :  { %v465_v5 = vpack.c.bf16 %v425_v1, %v423_v0  ;;  %v333_v6 = vpop.f32.mrb[24].mxu0 }
 0x144   :  { %v334_v7 = vadd.f32 %v333_v6, %v3017_v2  ;;  %v335_v8 = vpop.f32.mrb[25].mxu0 }
 0x145   :  { %v336_v9 = vadd.f32 %v335_v8, %v3020_v3  ;;  %v337_v10 = vpop.f32.mrb[26].mxu0  ;;  %766 = vmatprep.mubr.bf16.mxu1 %v465_v5 }
 0x146   :  { %v338_v11 = vadd.f32 %v337_v10, %v3017_v2  ;;  %v339_v12 = vpop.f32.mrb[27].mxu0  ;;  %767 = vmatmul.mubr.bf16.gmra.mrb[40].mxu1 %v464_v4  ;;  %v426_v15 = vmax.f32 %v334_v7, 0.0 }
 0x147   :  { %v340_v13 = vadd.f32 %v339_v12, %v3020_v3  ;;  %v427_v17 = vmax.f32 %v336_v9, 0.0 }
 0x148   :  { %v428_v16 = vmax.f32 %v338_v11, 0.0 }
 0x149   :  { %v429_v19 = vmax.f32 %v340_v13, 0.0 }
 0x14a   :  { %v466_v20 = vpack.c.bf16 %v428_v16, %v426_v15 }
 0x14b   :  { %v467_v21 = vpack.c.bf16 %v429_v19, %v427_v17  ;;  %v343_v23 = vpop.f32.mrb[28].mxu0 }
 0x14c   :  { %v344_v24 = vadd.f32 %v343_v23, %v3017_v2  ;;  %v345_v26 = vpop.f32.mrb[29].mxu0 }
 0x14d   :  { %v346_v27 = vadd.f32 %v345_v26, %v3020_v3  ;;  %v347_v28 = vpop.f32.mrb[30].mxu0  ;;  %776 = vmatprep.mubr.bf16.mxu1 %v467_v21 }
 0x14e   :  { %v348_v29 = vadd.f32 %v347_v28, %v3017_v2  ;;  %v349_v30 = vpop.f32.mrb[31].mxu0  ;;  %777 = vmatmul.mubr.bf16.gmra.mrb[44].mxu1 %v466_v20  ;;  %v430_v32 = vmax.f32 %v344_v24, 0.0  ;;  %v2519_v2 = vld [vmem:[#allocation7 + $0xe4] ss:$8 sps:$4 sm:$0xff]  }
 0x14f   :  { %v350_v31 = vadd.f32 %v349_v30, %v3020_v3  ;;  %v431_v34 = vmax.f32 %v346_v27, 0.0  ;;  %v2517_v3 = vld [vmem:[#allocation7 + $0xe0] ss:$8 sps:$4 sm:$0xff]   ;;  %1157 = vmatprep.subr.bf16.mxu0 %v2519_v2 }
 0x150   :  { %v432_v33 = vmax.f32 %v348_v29, 0.0  ;;  %1158 = vmatpush1.bf16.msra.mxu0 %v2517_v3 }
 0x151   :  { %v433_v35 = vmax.f32 %v350_v31, 0.0  ;;  %1159 = vmatprep.subr.bf16.mxu0 %v2522_v38 }
 0x152   :  { %v468_v36 = vpack.c.bf16 %v432_v33, %v430_v32 }
 0x153   :  { %v469_v37 = vpack.c.bf16 %v433_v35, %v431_v34 }
 0x155   :  { %786 = vmatprep.mubr.bf16.mxu1 %v469_v37 }
 0x156   :  { %787 = vmatmul.mubr.bf16.gmra.mrb[48].mxu1 %v468_v36 }
 0x157   :  { %796 = vmatprep.mubr.bf16.mxu1 %v3035_v45  ;;  %v2520_v45 = vld [vmem:[#allocation7 + $0xf0] ss:$8 sps:$4 sm:$0xff]  }
 0x158   :  { %1160 = vmatpush1.bf16.msra.mxu0 %v2520_v45 }
 0x15e   :  { %797 = vmatmul.mubr.bf16.gmra.mrb[52].mxu1 %v3032_v41  ;;  %v512_v41 = vld [vmem:[%s4323_s5] sm:$0x3] }
 0x15f   :  { %806 = vmatprep.mubr.bf16.mxu1 %v3047_v18  ;;  %v3105_v18 = vrot.slane %v512_v41, %v3014_v63 }
 0x166   :  { %807 = vmatmul.mubr.bf16.gmra.mrb[56].mxu1 %v3044_v14  ;;  %v3102_v14 = vrot.slane %v512_v41, %v3009_v61 }
 0x167   :  { %816 = vmatprep.mubr.bf16.mxu1 %v3059_v52 }
 0x16e   :  { %817 = vmatmul.mubr.bf16.gmra.mrb[60].mxu1 %v3056_v48 }
 0x16f   :  { %826 = vmatprep.mubr.bf16.mxu1 %v3071_v25 }
 0x176   :  { %827 = vmatmul.mubr.bf16.gmra.mrb[64].mxu1 %v3068_v22 }
 0x177   :  { %836 = vmatprep.mubr.bf16.mxu1 %v479_v58 }
 0x17e   :  { %837 = vmatmul.mubr.bf16.gmra.mrb[68].mxu1 %v478_v54 }
 0x1f1   :  { %v718_v48 = vpop.f32.mrb[20].mxu1 }
 0x1f2   :  { %v719_v52 = vadd.f32 %v718_v48, %v3102_v14  ;;  %v720_v22 = vpop.f32.mrb[21].mxu1 }
 0x1f3   :  { %v721_v25 = vadd.f32 %v720_v22, %v3105_v18  ;;  %v722_v39 = vpop.f32.mrb[22].mxu1 }
 0x1f4   :  { %v723_v40 = vadd.f32 %v722_v39, %v3102_v14  ;;  %v724_v42 = vpop.f32.mrb[23].mxu1  ;;  %v847_v44 = vmax.f32 %v719_v52, 0.0 }
 0x1f5   :  { %v725_v43 = vadd.f32 %v724_v42, %v3105_v18  ;;  %v848_v47 = vmax.f32 %v721_v25, 0.0 }
 0x1f6   :  { %v849_v46 = vmax.f32 %v723_v40, 0.0 }
 0x1f7   :  { %v850_v49 = vmax.f32 %v725_v43, 0.0 }
 0x1f8   :  { %v899_v50 = vpack.c.bf16 %v849_v46, %v847_v44 }
 0x1f9   :  { %v900_v51 = vpack.c.bf16 %v850_v49, %v848_v47  ;;  %v728_v53 = vpop.f32.mrb[24].mxu1 }
 0x1fa   :  { %v729_v54 = vadd.f32 %v728_v53, %v3102_v14  ;;  %v730_v56 = vpop.f32.mrb[25].mxu1 }
 0x1fb   :  { %v731_v57 = vadd.f32 %v730_v56, %v3105_v18  ;;  %v732_v58 = vpop.f32.mrb[26].mxu1  ;;  %1161 = vmatprep.mubr.bf16.mxu0 %v900_v51 }
 0x1fc   :  { %v733_v59 = vadd.f32 %v732_v58, %v3102_v14  ;;  %v734_v60 = vpop.f32.mrb[27].mxu1  ;;  %1162 = vmatmul.mubr.bf16.vlgmr.msra.gmra.mrb[32].mxu0 %v899_v50  ;;  %v851_v0 = vmax.f32 %v729_v54, 0.0 }
 0x1fd   :  { %v735_v62 = vadd.f32 %v734_v60, %v3105_v18  ;;  %v852_v4 = vmax.f32 %v731_v57, 0.0 }
 0x1fe   :  { %v853_v1 = vmax.f32 %v733_v59, 0.0 }
 0x1ff   :  { %v854_v5 = vmax.f32 %v735_v62, 0.0 }
 0x200   :  { %v901_v6 = vpack.c.bf16 %v853_v1, %v851_v0 }
 0x201   :  { %v902_v7 = vpack.c.bf16 %v854_v5, %v852_v4  ;;  %v738_v8 = vpop.f32.mrb[28].mxu1 }
 0x202   :  { %v739_v9 = vadd.f32 %v738_v8, %v3102_v14  ;;  %v740_v10 = vpop.f32.mrb[29].mxu1 }
 0x203   :  { %v741_v11 = vadd.f32 %v740_v10, %v3105_v18  ;;  %v742_v12 = vpop.f32.mrb[30].mxu1  ;;  %1171 = vmatprep.mubr.bf16.mxu0 %v902_v7 }
 0x204   :  { %v743_v13 = vadd.f32 %v742_v12, %v3102_v14  ;;  %v744_v15 = vpop.f32.mrb[31].mxu1  ;;  %1172 = vmatmul.mubr.bf16.gmra.mrb[36].mxu0 %v901_v6  ;;  %v855_v17 = vmax.f32 %v739_v9, 0.0 }
 0x205   :  { %v745_v16 = vadd.f32 %v744_v15, %v3105_v18  ;;  %v856_v20 = vmax.f32 %v741_v11, 0.0 }
 0x206   :  { %v857_v19 = vmax.f32 %v743_v13, 0.0 }
 0x207   :  { %v858_v21 = vmax.f32 %v745_v16, 0.0 }
 0x208   :  { %v903_v23 = vpack.c.bf16 %v857_v19, %v855_v17 }
 0x209   :  { %v904_v24 = vpack.c.bf16 %v858_v21, %v856_v20  ;;  %v748_v26 = vpop.f32.mrb[32].mxu1 }
 0x20a   :  { %v749_v27 = vadd.f32 %v748_v26, %v3102_v14  ;;  %v750_v28 = vpop.f32.mrb[33].mxu1 }
 0x20b   :  { %v751_v29 = vadd.f32 %v750_v28, %v3105_v18  ;;  %v752_v30 = vpop.f32.mrb[34].mxu1  ;;  %1181 = vmatprep.mubr.bf16.mxu0 %v904_v24 }
 0x20c   :  { %v753_v31 = vadd.f32 %v752_v30, %v3102_v14  ;;  %v754_v32 = vpop.f32.mrb[35].mxu1  ;;  %1182 = vmatmul.mubr.bf16.gmra.mrb[40].mxu0 %v903_v23  ;;  %v859_v34 = vmax.f32 %v749_v27, 0.0 }
 0x20d   :  { %v755_v33 = vadd.f32 %v754_v32, %v3105_v18  ;;  %v860_v36 = vmax.f32 %v751_v29, 0.0 }
 0x20e   :  { %v861_v35 = vmax.f32 %v753_v31, 0.0 }
 0x20f   :  { %v862_v37 = vmax.f32 %v755_v33, 0.0 }
 0x210   :  { %v905_v2 = vpack.c.bf16 %v861_v35, %v859_v34 }
 0x211   :  { %v906_v3 = vpack.c.bf16 %v862_v37, %v860_v36  ;;  %v758_v38 = vpop.f32.mrb[36].mxu1 }
 0x212   :  { %v759_v45 = vadd.f32 %v758_v38, %v3102_v14  ;;  %v760_v41 = vpop.f32.mrb[37].mxu1 }
 0x213   :  { %v761_v48 = vadd.f32 %v760_v41, %v3105_v18  ;;  %v762_v52 = vpop.f32.mrb[38].mxu1  ;;  %1191 = vmatprep.mubr.bf16.mxu0 %v906_v3 }
 0x214   :  { %v763_v22 = vadd.f32 %v762_v52, %v3102_v14  ;;  %v764_v25 = vpop.f32.mrb[39].mxu1  ;;  %1192 = vmatmul.mubr.bf16.gmra.mrb[44].mxu0 %v905_v2  ;;  %v863_v40 = vmax.f32 %v759_v45, 0.0 }
 0x215   :  { %v765_v39 = vadd.f32 %v764_v25, %v3105_v18  ;;  %v864_v43 = vmax.f32 %v761_v48, 0.0 }
 0x216   :  { %v865_v42 = vmax.f32 %v763_v22, 0.0 }
 0x217   :  { %v866_v44 = vmax.f32 %v765_v39, 0.0 }
 0x218   :  { %v907_v46 = vpack.c.bf16 %v865_v42, %v863_v40 }
 0x219   :  { %v908_v47 = vpack.c.bf16 %v866_v44, %v864_v43  ;;  %v768_v49 = vpop.f32.mrb[40].mxu1 }
 0x21a   :  { %v769_v50 = vadd.f32 %v768_v49, %v3102_v14  ;;  %v770_v51 = vpop.f32.mrb[41].mxu1 }
 0x21b   :  { %v771_v53 = vadd.f32 %v770_v51, %v3105_v18  ;;  %v772_v54 = vpop.f32.mrb[42].mxu1  ;;  %1201 = vmatprep.mubr.bf16.mxu0 %v908_v47 }
 0x21c   :  { %v773_v56 = vadd.f32 %v772_v54, %v3102_v14  ;;  %v774_v57 = vpop.f32.mrb[43].mxu1  ;;  %1202 = vmatmul.mubr.bf16.gmra.mrb[48].mxu0 %v907_v46  ;;  %v867_v59 = vmax.f32 %v769_v50, 0.0 }
 0x21d   :  { %v775_v58 = vadd.f32 %v774_v57, %v3105_v18  ;;  %v868_v62 = vmax.f32 %v771_v53, 0.0 }
 0x21e   :  { %v869_v60 = vmax.f32 %v773_v56, 0.0 }
 0x21f   :  { %v870_v0 = vmax.f32 %v775_v58, 0.0 }
 0x220   :  { %v909_v1 = vpack.c.bf16 %v869_v60, %v867_v59 }
 0x221   :  { %v910_v4 = vpack.c.bf16 %v870_v0, %v868_v62  ;;  %v778_v5 = vpop.f32.mrb[44].mxu1 }
 0x222   :  { %v779_v6 = vadd.f32 %v778_v5, %v3102_v14  ;;  %v780_v7 = vpop.f32.mrb[45].mxu1 }
 0x223   :  { %v781_v8 = vadd.f32 %v780_v7, %v3105_v18  ;;  %v782_v9 = vpop.f32.mrb[46].mxu1  ;;  %1211 = vmatprep.mubr.bf16.mxu0 %v910_v4 }
 0x224   :  { %v783_v10 = vadd.f32 %v782_v9, %v3102_v14  ;;  %v784_v11 = vpop.f32.mrb[47].mxu1  ;;  %1212 = vmatmul.mubr.bf16.gmra.mrb[52].mxu0 %v909_v1  ;;  %v871_v13 = vmax.f32 %v779_v6, 0.0 }
 0x225   :  { %v785_v12 = vadd.f32 %v784_v11, %v3105_v18  ;;  %v872_v16 = vmax.f32 %v781_v8, 0.0 }
 0x226   :  { %v873_v15 = vmax.f32 %v783_v10, 0.0 }
 0x227   :  { %v874_v17 = vmax.f32 %v785_v12, 0.0 }
 0x228   :  { %v911_v19 = vpack.c.bf16 %v873_v15, %v871_v13 }
 0x229   :  { %v912_v20 = vpack.c.bf16 %v874_v17, %v872_v16  ;;  %v788_v21 = vpop.f32.mrb[48].mxu1 }
 0x22a   :  { %v789_v23 = vadd.f32 %v788_v21, %v3102_v14  ;;  %v790_v24 = vpop.f32.mrb[49].mxu1 }
 0x22b   :  { %v791_v26 = vadd.f32 %v790_v24, %v3105_v18  ;;  %v792_v27 = vpop.f32.mrb[50].mxu1  ;;  %1221 = vmatprep.mubr.bf16.mxu0 %v912_v20 }
 0x22c   :  { %v793_v28 = vadd.f32 %v792_v27, %v3102_v14  ;;  %v794_v29 = vpop.f32.mrb[51].mxu1  ;;  %1222 = vmatmul.mubr.bf16.gmra.mrb[56].mxu0 %v911_v19  ;;  %v875_v31 = vmax.f32 %v789_v23, 0.0 }
 0x22d   :  { %v795_v30 = vadd.f32 %v794_v29, %v3105_v18  ;;  %v876_v33 = vmax.f32 %v791_v26, 0.0 }
 0x22e   :  { %v877_v32 = vmax.f32 %v793_v28, 0.0 }
 0x22f   :  { %v878_v34 = vmax.f32 %v795_v30, 0.0 }
 0x230   :  { %v913_v35 = vpack.c.bf16 %v877_v32, %v875_v31 }
 0x231   :  { %v914_v36 = vpack.c.bf16 %v878_v34, %v876_v33  ;;  %v798_v37 = vpop.f32.mrb[52].mxu1 }
 0x232   :  { %v799_v2 = vadd.f32 %v798_v37, %v3102_v14  ;;  %v800_v3 = vpop.f32.mrb[53].mxu1 }
 0x233   :  { %v801_v38 = vadd.f32 %v800_v3, %v3105_v18  ;;  %v802_v45 = vpop.f32.mrb[54].mxu1  ;;  %1231 = vmatprep.mubr.bf16.mxu0 %v914_v36 }
 0x234   :  { %v803_v41 = vadd.f32 %v802_v45, %v3102_v14  ;;  %v804_v48 = vpop.f32.mrb[55].mxu1  ;;  %1232 = vmatmul.mubr.bf16.gmra.mrb[60].mxu0 %v913_v35  ;;  %v879_v22 = vmax.f32 %v799_v2, 0.0 }
 0x235   :  { %v805_v52 = vadd.f32 %v804_v48, %v3105_v18  ;;  %v880_v39 = vmax.f32 %v801_v38, 0.0 }
 0x236   :  { %v881_v25 = vmax.f32 %v803_v41, 0.0 }
 0x237   :  { %v882_v40 = vmax.f32 %v805_v52, 0.0 }
 0x238   :  { %v915_v42 = vpack.c.bf16 %v881_v25, %v879_v22 }
 0x239   :  { %v916_v43 = vpack.c.bf16 %v882_v40, %v880_v39  ;;  %v808_v44 = vpop.f32.mrb[56].mxu1  ;;  %v957_v40 = vld [vmem:[%s4325_s7] sm:$0x3]  ;;  %s2831_s7 = smov [#allocation8]  }
 0x23a   :  { %v809_v46 = vadd.f32 %v808_v44, %v3102_v14  ;;  %v810_v47 = vpop.f32.mrb[57].mxu1  ;;  %s2262_s4 = sshll.u32 %s2831_s7, 4  ;;  %s2263_s4 = int_to_ptr.vmem [resolvable:$true] %s2262_s4 }
 0x23b   :  { %v811_v49 = vadd.f32 %v810_v47, %v3105_v18  ;;  %v812_v50 = vpop.f32.mrb[58].mxu1  ;;  %1241 = vmatprep.mubr.bf16.mxu0 %v916_v43  ;;  %s2797_s2 = scalar_lea.vmem %s2263_s4, 6656  ;;  %p2802_p11 = scmp.lt.s32.totalorder %s2263_s4, %s2263_s4 }
 0x23c   :  { %v813_v51 = vadd.f32 %v812_v50, %v3102_v14  ;;  %v814_v53 = vpop.f32.mrb[59].mxu1  ;;  %1242 = vmatmul.mubr.bf16.gmra.mrb[64].mxu0 %v915_v42  ;;  %v883_v56 = vmax.f32 %v809_v46, 0.0  ;;  %v3163_v42 = vrot.slane %v957_v40, %v3014_v63  ;;  %p2798_p10 = scmp.ne.s32.totalorder %s2263_s4, %s2797_s2  ;;  %p2803_p12 = scmp.lt.s32.totalorder %s2797_s2, %s2797_s2 }
 0x23d   :  { %v815_v54 = vadd.f32 %v814_v53, %v3105_v18  ;;  %v884_v58 = vmax.f32 %v811_v49, 0.0 }
 0x23e   :  { %v885_v57 = vmax.f32 %v813_v51, 0.0  ;;  %p2804_p13 = por %p2803_p12, %p2802_p11 }
 0x23f   :  { %v886_v59 = vmax.f32 %v815_v54, 0.0  ;;  %v3174_v54 = vld [vmem:[#allocation2] sm:$0xff] }
 0x240   :  { %v917_v60 = vpack.c.bf16 %v885_v57, %v883_v56  ;;  %v3180_v57 = vld [vmem:[#allocation2 + $0x8] sm:$0xff]  ;;  %p2805_p0 = pnand %p2804_p13, %p2798_p10 }
 0x241   :  { %v918_v62 = vpack.c.bf16 %v886_v59, %v884_v58  ;;  %v818_v0 = vpop.f32.mrb[60].mxu1 }
 0x242   :  { %v819_v1 = vadd.f32 %v818_v0, %v3102_v14  ;;  %v820_v4 = vpop.f32.mrb[61].mxu1 }
 0x243   :  { %v821_v5 = vadd.f32 %v820_v4, %v3105_v18  ;;  %v822_v6 = vpop.f32.mrb[62].mxu1  ;;  %1251 = vmatprep.mubr.bf16.mxu0 %v918_v62  ;;  %v3184_v62 = vld [vmem:[#allocation2 + $0x10] sm:$0xff]  ;;  %v3190_v4 = vld [vmem:[#allocation2 + $0x20] sm:$0xff] }
 0x244   :  { %v823_v7 = vadd.f32 %v822_v6, %v3102_v14  ;;  %v824_v8 = vpop.f32.mrb[63].mxu1  ;;  %1252 = vmatmul.mubr.bf16.gmra.mrb[68].mxu0 %v917_v60  ;;  %v887_v10 = vmax.f32 %v819_v1, 0.0  ;;  %v3188_v1 = vld [vmem:[#allocation2 + $0x18] sm:$0xff] }
 0x245   :  { %v825_v9 = vadd.f32 %v824_v8, %v3105_v18  ;;  %v888_v12 = vmax.f32 %v821_v5, 0.0  ;;  %v1500_v5 = vmul.f32 -0.5, %v3174_v54 }
 0x246   :  { %v889_v11 = vmax.f32 %v823_v7, 0.0  ;;  %v1501_v7 = vmul.f32 -0.5, %v3180_v57 }
 0x247   :  { %v890_v13 = vmax.f32 %v825_v9, 0.0 }
 0x248   :  { %v919_v15 = vpack.c.bf16 %v889_v11, %v887_v10  ;;  %v3195_v10 = vld [vmem:[#allocation2 + $0x28] sm:$0xff]  ;;  %v3197_v11 = vld [vmem:[#allocation2 + $0x30] sm:$0xff] }
 0x249   :  { %v920_v16 = vpack.c.bf16 %v890_v13, %v888_v12  ;;  %v828_v17 = vpop.f32.mrb[64].mxu1  ;;  %v3199_v12 = vld [vmem:[#allocation2 + $0x38] sm:$0xff]  ;;  %v1502_v13 = vmul.f32 -0.5, %v3184_v62 }
 0x24a   :  { %v829_v19 = vadd.f32 %v828_v17, %v3102_v14  ;;  %v830_v20 = vpop.f32.mrb[65].mxu1 }
 0x24b   :  { %v831_v21 = vadd.f32 %v830_v20, %v3105_v18  ;;  %v832_v23 = vpop.f32.mrb[66].mxu1  ;;  %1261 = vmatprep.mubr.bf16.mxu0 %v920_v16  ;;  %v1504_v16 = vmul.f32 -0.5, %v3190_v4  ;;  %v3206_v20 = vld [vmem:[#allocation2 + $0x40] sm:$0xff] }
 0x24c   :  { %v833_v24 = vadd.f32 %v832_v23, %v3102_v14  ;;  %v834_v26 = vpop.f32.mrb[67].mxu1  ;;  %1262 = vmatmul.mubr.bf16.gmra.mrb[72].mxu0 %v919_v15  ;;  %v891_v28 = vmax.f32 %v829_v19, 0.0  ;;  %v1503_v15 = vmul.f32 -0.5, %v3188_v1  ;;  %4352 = vst [vmem:[#allocation12_spill] sm:$0xff] %v3206_v20  ;;  %v1505_v23 = vmul.f32 -0.5, %v3195_v10 }
 0x24d   :  { %v835_v27 = vadd.f32 %v834_v26, %v3105_v18  ;;  %v892_v30 = vmax.f32 %v831_v21, 0.0  ;;  %v3209_v21 = vrot.slane %v957_v40, %v3009_v61  ;;  %v1507_v26 = vmul.f32 -0.5, %v3199_v12 }
 0x24e   :  { %v893_v29 = vmax.f32 %v833_v24, 0.0  ;;  %v1506_v24 = vmul.f32 -0.5, %v3197_v11 }
 0x24f   :  { %v894_v31 = vmax.f32 %v835_v27, 0.0  ;;  %v3214_v27 = vld [vmem:[#allocation2 + $0x48] sm:$0xff] }
 0x250   :  { %v921_v32 = vpack.c.bf16 %v893_v29, %v891_v28  ;;  %4353 = vst [vmem:[#allocation13_spill] sm:$0xff] %v3214_v27  ;;  %v3217_v28 = vmul.f32 %v1500_v5, %v3174_v54  ;;  %v3220_v29 = vmul.f32 %v1501_v7, %v3180_v57  ;;  %v3256_v40 = vmul.f32 %v1506_v24, %v3197_v11 }
 0x251   :  { %v922_v33 = vpack.c.bf16 %v894_v31, %v892_v30  ;;  %v838_v34 = vpop.f32.mrb[68].mxu1 }
 0x252   :  { %v839_v35 = vadd.f32 %v838_v34, %v3102_v14  ;;  %v840_v36 = vpop.f32.mrb[69].mxu1  ;;  %v3232_v34 = vmul.f32 %v1502_v13, %v3184_v62 }
 0x253   :  { %v841_v37 = vadd.f32 %v840_v36, %v3105_v18  ;;  %v842_v2 = vpop.f32.mrb[70].mxu1  ;;  %1271 = vmatprep.mubr.bf16.mxu0 %v922_v33  ;;  %v3229_v33 = vld [vmem:[#allocation2 + $0x58] sm:$0xff] }
 0x254   :  { %v843_v3 = vadd.f32 %v842_v2, %v3102_v14  ;;  %v844_v38 = vpop.f32.mrb[71].mxu1  ;;  %1272 = vmatmul.mubr.bf16.gmra.mrb[76].mxu0 %v921_v32  ;;  %v895_v41 = vmax.f32 %v839_v35, 0.0  ;;  %v3227_v32 = vld [vmem:[#allocation2 + $0x50] sm:$0xff]  ;;  %4355 = vst [vmem:[#allocation15_spill] sm:$0xff] %v3229_v33  ;;  %v3235_v35 = vmul.f32 %v1503_v15, %v3188_v1  ;;  %v1508_v2 = vmul.f32 -0.5, %v3206_v20 }
 0x255   :  { %v845_v45 = vadd.f32 %v844_v38, %v3105_v18  ;;  %v896_v52 = vmax.f32 %v841_v37, 0.0  ;;  %4354 = vst [vmem:[#allocation14_spill] sm:$0xff] %v3227_v32  ;;  %v3238_v37 = vmul.f32 %v1504_v16, %v3190_v4  ;;  %v3287_v16 = vld [vmem:[#allocation2 + $0x80] sm:$0xff] }
 0x256   :  { %v897_v48 = vmax.f32 %v843_v3, 0.0  ;;  %v3241_v3 = vld [vmem:[#allocation2 + $0x60] sm:$0xff] }
 0x257   :  { %v898_v22 = vmax.f32 %v845_v45, 0.0  ;;  %4356 = vst [vmem:[#allocation16_spill] sm:$0xff] %v3241_v3 }
 0x258   :  { %v923_v25 = vpack.c.bf16 %v897_v48, %v895_v41  ;;  %v1509_v48 = vmul.f32 -0.5, %v3214_v27 }
 0x259   :  { %v924_v39 = vpack.c.bf16 %v898_v22, %v896_v52  ;;  %v3248_v52 = vld [vmem:[#allocation2 + $0x68] sm:$0xff]  ;;  %v3250_v22 = vld [vmem:[#allocation2 + $0x70] sm:$0xff] }
 0x25a   :  { %4357 = vst [vmem:[#allocation17_spill] sm:$0xff] %v3248_v52  ;;  %4358 = vst [vmem:[#allocation18_spill] sm:$0xff] %v3250_v22  ;;  %v1513_v5 = vmul.f32 -0.5, %v3248_v52  ;;  %v3278_v13 = vmul.f32 %v1509_v48, %v3214_v27 }
 0x25b   :  { %1281 = vmatprep.mubr.bf16.mxu0 %v924_v39  ;;  %v3253_v39 = vmul.f32 %v1505_v23, %v3195_v10 }
 0x25c   :  { %1282 = vmatmul.mubr.bf16.gmra.mrb[80].mxu0 %v923_v25  ;;  %v3303_v48 = vmul.f32 %v1513_v5, %v3248_v52 }
 0x2cf   :  { %v3165_v14 = vpop.f32.mrb[32].mxu0 }
 0x2d0   :  { %v1165_v43 = vpop.f32.mrb[33].mxu0 }
 0x2d1   :  { %v1166_v18 = vadd.f32 %v1165_v43, %v3163_v42  ;;  %v3168_v44 = vpop.f32.mrb[34].mxu0  ;;  %v1510_v43 = vmul.f32 -0.5, %v3227_v32 }
 0x2d2   :  { %v1169_v46 = vpop.f32.mrb[35].mxu0 }
 0x2d3   :  { %v1292_v47 = vmax.f32 %v1166_v18, -20.0  ;;  %v1170_v49 = vadd.f32 %v1169_v46, %v3163_v42  ;;  %v1511_v18 = vmul.f32 -0.5, %v3229_v33  ;;  %v3281_v15 = vmul.f32 %v1510_v43, %v3227_v32  ;;  %v3312_v43 = vld [vmem:[#allocation2 + $0x98] sm:$0xff] }
 0x2d4   :  { %4363 = vst [vmem:[#allocation23_spill] sm:$0xff] %v3312_v43 }
 0x2d5   :  { %v3171_v50 = vmin.f32 %v1292_v47, 2.0  ;;  %v1293_v51 = vmax.f32 %v1170_v49, -20.0 }
 0x2d7   :  { %v1344_v53 = vmul.f32 1.442695, %v3171_v50  ;;  %v3176_v63 = vmin.f32 %v1293_v51, 2.0  ;;  %v3178_v56 = vpop.f32.mrb[36].mxu0  ;;  %v3262_v51 = vmul.f32 %v1507_v26, %v3199_v12 }
 0x2d8   :  { %v1175_v58 = vpop.f32.mrb[37].mxu0 }
 0x2d9   :  { %2523 = vpow2.f32 %v1344_v53  ;;  %v1346_v59 = vmul.f32 1.442695, %v3176_v63  ;;  %v1176_v60 = vadd.f32 %v1175_v58, %v3163_v42  ;;  %v3186_v0 = vpop.f32.mrb[38].mxu0  ;;  %v1512_v53 = vmul.f32 -0.5, %v3241_v3  ;;  %v3265_v58 = vld [vmem:[#allocation2 + $0x78] sm:$0xff] }
 0x2da   :  { %v1179_v6 = vpop.f32.mrb[39].mxu0  ;;  %4359 = vst [vmem:[#allocation19_spill] sm:$0xff] %v3265_v58 }
 0x2db   :  { %2525 = vpow2.f32 %v1346_v59  ;;  %v1294_v8 = vmax.f32 %v1176_v60, -20.0  ;;  %v1180_v9 = vadd.f32 %v1179_v6, %v3163_v42  ;;  %v1164_v59 = vadd.f32 %v3165_v14, %v3209_v21 }
 0x2dc   :  { %v1514_v6 = vmul.f32 -0.5, %v3250_v22  ;;  %v3284_v14 = vmul.f32 %v1511_v18, %v3229_v33  ;;  %v3314_v18 = vld [vmem:[#allocation2 + $0xa0] sm:$0xff] }
 0x2dd   :  { %v3204_v17 = vmin.f32 %v1294_v8, 2.0  ;;  %v1295_v19 = vmax.f32 %v1180_v9, -20.0  ;;  %v3275_v9 = vmul.f32 %v1508_v2, %v3206_v20  ;;  %v3298_v2 = vld [vmem:[#allocation2 + $0x88] sm:$0xff]  ;;  %4364 = vst [vmem:[#allocation24_spill] sm:$0xff] %v3314_v18 }
 0x2de   :  { %4360 = vst [vmem:[#allocation20_spill] sm:$0xff] %v3298_v2  ;;  %v1517_v5 = vmul.f32 -0.5, %v3298_v2 }
 0x2df   :  { %v1348_v30 = vmul.f32 1.442695, %v3204_v17  ;;  %v3223_v31 = vmin.f32 %v1295_v19, 2.0  ;;  %v3225_v61 = vpop.f32.mrb[40].mxu0 }
 0x2e0   :  { %v1185_v36 = vpop.f32.mrb[41].mxu0  ;;  %v3361_v27 = vmul.f32 %v1517_v5, %v3298_v2 }
 0x2e1   :  { %2527 = vpow2.f32 %v1348_v30  ;;  %v1350_v38 = vmul.f32 1.442695, %v3223_v31  ;;  %v1186_v45 = vadd.f32 %v1185_v36, %v3163_v42  ;;  %v3245_v41 = vpop.f32.mrb[42].mxu0  ;;  %v3296_v36 = vmul.f32 %v1512_v53, %v3241_v3 }
 0x2e2   :  { %v1189_v25 = vpop.f32.mrb[43].mxu0  ;;  %v3322_v53 = vand.u32 127, %v104_v55  ;;  %v1519_v55 = vmul.f32 -0.5, %v3312_v43  ;;  %v1520_v3 = vmul.f32 -0.5, %v3314_v18 }
 0x2e3   :  { %v2524_v46 = vpop.eup %2523  ;;  %v1296_v47 = vmax.f32 %v1186_v45, -20.0  ;;  %v1190_v49 = vadd.f32 %v1189_v25, %v3163_v42  ;;  %2529 = vpow2.f32 %v1350_v38  ;;  %v3300_v38 = vld [vmem:[#allocation2 + $0x90] sm:$0xff]  ;;  %v3306_v25 = vmul.f32 %v1514_v6, %v3250_v22  ;;  %v3330_v22 = vld [vmem:[#allocation2 + $0xa8] sm:$0xff] }
 0x2e4   :  { %v1422_v60 = vmul.f32 %v2524_v46, %v3174_v54  ;;  %v1515_v54 = vmul.f32 -0.5, %v3265_v58  ;;  %4361 = vst [vmem:[#allocation21_spill] sm:$0xff] %v3300_v38  ;;  %v1168_v46 = vadd.f32 %v3168_v44, %v3209_v21  ;;  %4366 = vst [vmem:[#allocation26_spill] sm:$0xff] %v3330_v22  ;;  %vm2126_vm2 = vcmp.lt.s32.totalorder %v3322_v53, 6 }
 0x2e5   :  { %v2526_v7 = vpop.eup %2525  ;;  %v3272_v8 = vmin.f32 %v1296_v47, 2.0  ;;  %v1297_v26 = vmax.f32 %v1190_v49, -20.0  ;;  %4362 = vst [vmem:[#allocation22_spill] sm:$0xff] %v3306_v25  ;;  %v1516_v49 = vmul.f32 -0.5, %v3287_v16 }
 0x2e6   :  { %v3289_v19 = vadd.f32 %v1422_v60, %v1164_v59  ;;  %v1423_v23 = vmul.f32 %v2526_v7, %v3180_v57  ;;  %v3325_v60 = vmul.f32 %v1515_v54, %v3265_v58  ;;  %v1518_v7 = vmul.f32 -0.5, %v3300_v38 }
 0x2e7   :  { %v1352_v24 = vmul.f32 1.442695, %v3272_v8  ;;  %v3293_v30 = vpop.f32.mrb[44].mxu0  ;;  %v1174_v54 = vadd.f32 %v3178_v56, %v3209_v21  ;;  %v3351_v32 = vmul.f32 %v1516_v49, %v3287_v16 }
 0x2e8   :  { %v1195_v45 = vpop.f32.mrb[45].mxu0  ;;  %v3309_v57 = vmul.f32 -2.0, %v3289_v19  ;;  %2531 = vtanh.f32 %v3289_v19  ;;  %4365 = vst [vmem:[#allocation25_spill] sm:$0xff] %v3325_v60  ;;  %v3334_v52 = vadd.f32 %v1423_v23, %v1168_v46  ;;  %v1521_v23 = vmul.f32 -0.5, %v3330_v22 }
 0x2e9   :  { %2533 = vpow2.f32 %v1352_v24  ;;  %v3318_v47 = vpop.f32.mrb[46].mxu0  ;;  %v3332_v24 = vmin.f32 %v1297_v26, 2.0  ;;  %v1196_v33 = vadd.f32 %v1195_v45, %v3163_v42  ;;  %v1552_v46 = vsub.f32 %v3217_v28, %v3171_v50 }
 0x2ea   :  { %v1199_v59 = vpop.f32.mrb[47].mxu0  ;;  %v1656_v6 = vand.u32 2147483647, %v3309_v57  ;;  %2535 = vtanh.f32 %v3334_v52  ;;  %v3345_v26 = vmul.f32 -2.0, %v3334_v52  ;;  %v3365_v49 = vmul.f32 %v1518_v7, %v3300_v38 }
 0x2eb   :  { %v2528_v44 = vpop.eup %2527  ;;  %v1200_v25 = vadd.f32 %v1199_v59, %v3163_v42  ;;  %v1553_v59 = vsub.f32 %v3220_v29, %v3176_v63  ;;  %v1298_v50 = vmax.f32 %v1196_v33, -20.0  ;;  %v3376_v5 = vmul.f32 %v1521_v23, %v3330_v22 }
 0x2ec   :  { %v1424_v58 = vmul.f32 %v2528_v44, %v3184_v62  ;;  %v1682_v60 = vsub.f32 0.0, %v1656_v6  ;;  %v1354_v6 = vmul.f32 1.442695, %v3332_v24  ;;  %v1657_v20 = vand.u32 2147483647, %v3345_v26 }
 0x2ed   :  { %v2530_v45 = vpop.eup %2529  ;;  %4369 = vst [vmem:[#allocation29_spill] sm:$0xff] %v3376_v5  ;;  %v1178_v33 = vadd.f32 %v3186_v0, %v3209_v21  ;;  %v3381_v38 = vadd.f32 -0.9189385, %v1552_v46  ;;  %v1324_v5 = vmin.f32 %v1298_v50, 2.0 }
 0x2ee   :  { %v1708_v56 = vmul.f32 1.442695, %v1682_v60  ;;  %v3353_v62 = vadd.f32 %v1424_v58, %v1174_v54  ;;  %v3368_v58 = vmul.f32 %v1519_v55, %v3312_v43  ;;  %v1299_v60 = vmax.f32 %v1200_v25, -20.0 }
 0x2ef   :  { %v3358_v44 = vpop.f32.mrb[48].mxu0  ;;  %v1683_v29 = vsub.f32 0.0, %v1657_v20  ;;  %v3373_v54 = vmul.f32 %v1520_v3, %v3314_v18  ;;  %v1425_v7 = vmul.f32 %v2530_v45, %v3188_v1  ;;  %v3386_v20 = vadd.f32 -0.9189385, %v1553_v59 }
 0x2f0   :  { %v1205_v28 = vpop.f32.mrb[49].mxu0  ;;  %2537 = vpow2.f32 %v1708_v56  ;;  %4367 = vst [vmem:[#allocation27_spill] sm:$0xff] %v3368_v58  ;;  %v3384_v25 = vmul.f32 -2.0, %v3353_v62  ;;  %v1554_v3 = vsub.f32 %v3232_v34, %v3204_v17  ;;  %v1555_v45 = vsub.f32 %v3235_v35, %v3223_v31 }
 0x2f1   :  { %v3370_v63 = vpop.f32.mrb[50].mxu0  ;;  %4368 = vst [vmem:[#allocation28_spill] sm:$0xff] %v3373_v54  ;;  %2539 = vpow2.f32 %v1354_v6  ;;  %v1206_v23 = vadd.f32 %v1205_v28, %v3163_v42  ;;  %v1710_v1 = vmul.f32 1.442695, %v1683_v29  ;;  %v1184_v59 = vadd.f32 %v3225_v61, %v3209_v21 }
 0x2f2   :  { %v2532_v2 = vpop.eup %2531  ;;  %v1209_v56 = vpop.f32.mrb[51].mxu0  ;;  %v1658_v46 = vand.u32 2147483647, %v3384_v25  ;;  %v1325_v54 = vmin.f32 %v1299_v60, 2.0  ;;  %2541 = vtanh.f32 %v3353_v62  ;;  %v1556_v6 = vsub.f32 %v3238_v37, %v3272_v8 }
 0x2f3   :  { %v2534_v55 = vpop.eup %2533  ;;  %2205 = vst [vmem:[#allocation8] sm:$0xff] %v2532_v2  ;;  %v1210_v17 = vadd.f32 %v1209_v56, %v3163_v42  ;;  %2543 = vpow2.f32 %v1710_v1  ;;  %v3399_v2 = vadd.f32 %v1425_v7, %v1178_v33  ;;  %v1300_v50 = vmax.f32 %v1206_v23, -20.0 }
 0x2f4   :  { %v1426_v0 = vmul.f32 %v2534_v55, %v3190_v4  ;;  %v1684_v34 = vsub.f32 0.0, %v1658_v46  ;;  %v2536_v4 = vpop.eup %2535  ;;  %v3403_v29 = vadd.f32 -0.9189385, %v1554_v3  ;;  %v1557_v61 = vsub.f32 %v3253_v39, %v3332_v24 }
 0x2f5   :  { %v1356_v35 = vmul.f32 1.442695, %v1324_v5  ;;  %2206 = vst [vmem:[#allocation8 + $0x10] sm:$0xff] %v2536_v4  ;;  %2545 = vtanh.f32 %v3399_v2  ;;  %v3410_v33 = vadd.f32 -0.9189385, %v1555_v45  ;;  %v3414_v37 = vadd.f32 %v3245_v41, %v3209_v21 }
 0x2f6   :  { %v3405_v31 = vadd.f32 %v1426_v0, %v1184_v59  ;;  %v1712_v56 = vmul.f32 1.442695, %v1684_v34  ;;  %v3418_v8 = vadd.f32 %v3293_v30, %v3209_v21  ;;  %v1558_v55 = vsub.f32 %v3256_v40, %v1324_v5 }
 0x2f7   :  { %v1213_v28 = vpop.f32.mrb[52].mxu0  ;;  %v1358_v3 = vmul.f32 1.442695, %v1325_v54  ;;  %v1301_v23 = vmax.f32 %v1210_v17, -20.0  ;;  %v3426_v1 = vadd.f32 -0.9189385, %v1556_v6  ;;  %v1559_v41 = vsub.f32 %v3262_v51, %v1325_v54 }
 0x2f8   :  { %v1215_v60 = vpop.f32.mrb[53].mxu0  ;;  %2547 = vpow2.f32 %v1712_v56  ;;  %v1326_v46 = vmin.f32 %v1300_v50, 2.0  ;;  %v3430_v45 = vadd.f32 -0.9189385, %v1557_v61  ;;  %v3434_v59 = vadd.f32 %v3318_v47, %v3209_v21 }
 0x2f9   :  { %v3420_v7 = vpop.f32.mrb[54].mxu0  ;;  %4370 = vst [vmem:[#allocation30_spill] sm:$0xff] %v3426_v1  ;;  %2549 = vpow2.f32 %v1356_v35  ;;  %v1216_v17 = vadd.f32 %v1215_v60, %v3163_v42  ;;  %v3440_v54 = vadd.f32 -0.9189385, %v1558_v55  ;;  %v3444_v4 = vadd.f32 %v3358_v44, %v3209_v21 }
 0x2fa   :  { %v3423_v24 = vpop.eup %2537  ;;  %v1219_v0 = vpop.f32.mrb[55].mxu0  ;;  %4371 = vst [vmem:[#allocation31_spill] sm:$0xff] %v3430_v45  ;;  %v1327_v6 = vmin.f32 %v1301_v23, 2.0  ;;  %v3446_v50 = vadd.f32 -0.9189385, %v1559_v41  ;;  %v3450_v35 = vadd.f32 %v3370_v63, %v3209_v21  ;;  %v1560_v55 = vsub.f32 %v3275_v9, %v1326_v46 }
 0x2fb   :  { %v1760_v30 = vadd.f32 1.0, %v3423_v24  ;;  %v2540_v5 = vpop.eup %2539  ;;  %4372 = vst [vmem:[#allocation32_spill] sm:$0xff] %v3440_v54  ;;  %v1360_v61 = vmul.f32 1.442695, %v1326_v46  ;;  %v1763_v44 = vmul.f32 -0.5, %v3423_v24  ;;  %v3461_v41 = vmul.f32 -2.0, %v3399_v2 }
 0x2fc   :  { %v2542_v47 = vpop.eup %2541  ;;  %4373 = vst [vmem:[#allocation33_spill] sm:$0xff] %v3446_v50  ;;  %4374 = vst [vmem:[#allocation34_spill] sm:$0xff] %v3450_v35  ;;  %v1220_v63 = vadd.f32 %v1219_v0, %v3163_v42  ;;  %v3469_v9 = vmul.f32 %v2540_v5, %v3195_v10  ;;  %v1362_v46 = vmul.f32 1.442695, %v1327_v6  ;;  %v3472_v23 = vadd.f32 %v1213_v28, %v3209_v21 }
 0x2fd   :  { %2551 = vlog2.f32 %v1760_v30  ;;  %v3455_v56 = vpop.eup %2543  ;;  %2207 = vst [vmem:[#allocation8 + $0x20] sm:$0xff] %v2542_v47  ;;  %v1302_v30 = vmax.f32 %v1216_v17, -20.0  ;;  %v1561_v0 = vsub.f32 %v3278_v13, %v1327_v6  ;;  %v3480_v45 = vadd.f32 -0.9189385, %v1560_v55 }
 0x2fe   :  { %2553 = vpow2.f32 %v1358_v3  ;;  %v1769_v39 = vadd.f32 1.0, %v3455_v56  ;;  %4375 = vst [vmem:[#allocation35_spill] sm:$0xff] %v3472_v23  ;;  %v1764_v10 = vadd.f32 1.0, %v1763_v44  ;;  %v1659_v28 = vand.u32 2147483647, %v3461_v41 }
 0x2ff   :  { %v3452_v60 = vpop.f32.mrb[56].mxu0  ;;  %2555 = vtanh.f32 %v3405_v31  ;;  %v2546_v40 = vpop.eup %2545  ;;  %4376 = vst [vmem:[#allocation36_spill] sm:$0xff] %v3480_v45  ;;  %v3483_v5 = vmin.f32 %v1302_v30, 2.0  ;;  %v1303_v22 = vmax.f32 %v1220_v63, -20.0  ;;  %v3488_v6 = vadd.f32 %v3420_v7, %v3209_v21 }
 0x300   :  { %v1225_v3 = vpop.f32.mrb[57].mxu0  ;;  %2557 = vpow2.f32 %v1360_v61  ;;  %2208 = vst [vmem:[#allocation8 + $0x30] sm:$0xff] %v2546_v40  ;;  %v3491_v44 = vadd.f32 -0.9189385, %v1561_v0  ;;  %v1765_v7 = vmul.f32 %v3423_v24, %v1764_v10  ;;  %v3502_v55 = vmul.f32 -2.0, %v3405_v31 }
 0x301   :  { %v1226_v51 = vadd.f32 %v1225_v3, %v3163_v42  ;;  %v3465_v34 = vpop.f32.mrb[58].mxu0  ;;  %v1766_v3 = vand.u32 2147483647, %v3423_v24  ;;  %2559 = vlog2.f32 %v1769_v39  ;;  %4377 = vst [vmem:[#allocation37_spill] sm:$0xff] %v3488_v6  ;;  %v3508_v6 = vmin.f32 %v1303_v22, 2.0 }
 0x302   :  { %v1229_v47 = vpop.f32.mrb[59].mxu0  ;;  %v3478_v54 = vpop.eup %2547  ;;  %2561 = vpow2.f32 %v1362_v46  ;;  %4378 = vst [vmem:[#allocation38_spill] sm:$0xff] %v3491_v44  ;;  %v1775_v30 = vand.u32 2147483647, %v3455_v56 }
 0x303   :  { %v1230_v17 = vadd.f32 %v1229_v47, %v3163_v42  ;;  %v1304_v50 = vmax.f32 %v1226_v51, -20.0  ;;  %v1778_v61 = vadd.f32 1.0, %v3478_v54  ;;  %v2550_v13 = vpop.eup %2549  ;;  %vm3495_vm1 = vcmp.lt.f32.partialorder %v1766_v3, 0.0004427343 }
 0x304   :  { %v1772_v51 = vmul.f32 -0.5, %v3455_v56  ;;  %v3505_v44 = vmul.f32 %v2550_v13, %v3197_v11  ;;  %v1364_v3 = vmul.f32 1.442695, %v3483_v5  ;;  %v4381_v13 = vmax.f32 %v3309_v57, 0.0 }
 0x305   :  { %v1305_v40 = vmax.f32 %v1230_v17, -20.0  ;;  %2563 = vlog2.f32 %v1778_v61  ;;  %v1685_v17 = vsub.f32 0.0, %v1659_v28  ;;  %v3510_v18 = vmin.f32 %v1304_v50, 2.0 }
 0x306   :  { %v1781_v28 = vmul.f32 -0.5, %v3478_v54  ;;  %v1562_v50 = vsub.f32 %v3281_v15, %v3483_v5  ;;  %2565 = vpow2.f32 %v1364_v3  ;;  %v3541_v3 = vadd.f32 %v3469_v9, %v3414_v37 }
 0x307   :  { %v2552_v47 = vpop.eup %2551  ;;  %v3493_v39 = vpop.f32.mrb[60].mxu0  ;;  %vm3548_vm3 = vcmp.lt.f32.partialorder %v1775_v30, 0.0004427343  ;;  %v1784_v9 = vand.u32 2147483647, %v3478_v54 }
 0x308   :  { %v2554_v63 = vpop.eup %2553  ;;  %v1235_v46 = vpop.f32.mrb[61].mxu0  ;;  %v1762_v45 = vmul.f32 0.6931472, %v2552_v47  ;;  %v3515_v47 = vmin.f32 %v1305_v40, 2.0  ;;  %v1773_v40 = vadd.f32 1.0, %v1772_v51  ;;  %v1782_v51 = vadd.f32 1.0, %v1781_v28 }
 0x309   :  { %v2556_v0 = vpop.eup %2555  ;;  %v3512_v61 = vpop.f32.mrb[62].mxu0  ;;  %v3522_v22 = vmul.f32 %v2554_v63, %v3199_v12  ;;  %v1236_v23 = vadd.f32 %v1235_v46, %v3163_v42  ;;  %v1368_v12 = vmul.f32 1.442695, %v3510_v18  ;;  %v4382_v63 = vsub.f32 0.6931472, %v3289_v19 }
 0x30a   :  { %v1239_v24 = vpop.f32.mrb[63].mxu0  ;;  %v1768_v10 = vsel %vm3495_vm1, %v1765_v7, %v1762_v45  ;;  %2209 = vst [vmem:[#allocation8 + $0x40] sm:$0xff] %v2556_v0  ;;  %v1714_v45 = vmul.f32 1.442695, %v1685_v17  ;;  %v1660_v7 = vand.u32 2147483647, %v3502_v55  ;;  %v2558_v35 = vpop.eup %2557  ;;  %v3545_v19 = vadd.f32 %v3452_v60, %v3209_v21 }
 0x30b   :  { %v1994_v43 = vadd.f32 %v1768_v10, %v4381_v13  ;;  %v1366_v0 = vmul.f32 1.442695, %v3508_v6  ;;  %v2560_v5 = vpop.eup %2559  ;;  %v1370_v57 = vmul.f32 1.442695, %v3515_v47  ;;  %v1240_v10 = vadd.f32 %v1239_v24, %v3163_v42 }
 0x30c   :  { %2567 = vpow2.f32 %v1714_v45  ;;  %v1686_v46 = vsub.f32 0.0, %v1660_v7  ;;  %v1771_v11 = vmul.f32 0.6931472, %v2560_v5  ;;  %v2562_v1 = vpop.eup %2561  ;;  %v1774_v28 = vmul.f32 %v3455_v56, %v1773_v40 }
 0x30d   :  { %v2046_v15 = vsub.f32 %v4382_v63, %v1994_v43  ;;  %v1306_v43 = vmax.f32 %v1236_v23, -20.0  ;;  %2569 = vpow2.f32 %v1366_v0  ;;  %v3556_v5 = vadd.f32 -0.9189385, %v1562_v50 }
 0x30e   :  { %v1563_v60 = vsub.f32 %v3284_v14, %v3508_v6  ;;  %2571 = vpow2.f32 %v1368_v12  ;;  %v1777_v23 = vsel %vm3548_vm3, %v1774_v28, %v1771_v11  ;;  %v3564_v40 = vadd.f32 %v3465_v34, %v3209_v21 }
 0x30f   :  { %v3537_v17 = vpop.f32.mrb[64].mxu0  ;;  %v2072_v13 = vmul.f32 2.0, %v2046_v15  ;;  %v2564_v24 = vpop.eup %2563  ;;  %v1716_v15 = vmul.f32 1.442695, %v1686_v46  ;;  %2573 = vpow2.f32 %v1370_v57  ;;  %v1307_v30 = vmax.f32 %v1240_v10, -20.0  ;;  %v4387_v10 = vld [vmem:[#allocation12_spill] sm:$0xff] }
 0x310   :  { %v1245_v63 = vpop.f32.mrb[65].mxu0  ;;  %v1332_v0 = vmin.f32 %v1306_v43, 2.0  ;;  %v4385_v46 = vmax.f32 %v3345_v26, 0.0  ;;  %v1780_v6 = vmul.f32 0.6931472, %v2564_v24  ;;  %v1564_v12 = vsub.f32 %v3296_v36, %v3510_v18  ;;  %v2566_v26 = vpop.eup %2565  ;;  %v4388_v43 = vld [vmem:[#allocation13_spill] sm:$0xff] }
 0x311   :  { %v3552_v7 = vpop.f32.mrb[66].mxu0  ;;  %v2098_v37 = vsub.f32 %v3381_v38, %v2072_v13  ;;  %v1783_v38 = vmul.f32 %v3478_v54, %v1782_v51  ;;  %v1246_v11 = vadd.f32 %v1245_v63, %v3163_v42  ;;  %vm1785_vm4 = vcmp.lt.f32.partialorder %v1784_v9, 0.0004427343 }
 0x312   :  { %v1249_v56 = vpop.f32.mrb[67].mxu0  ;;  %v1995_v14 = vadd.f32 %v1777_v23, %v4385_v46  ;;  %2575 = vpow2.f32 %v1716_v15  ;;  %v1565_v34 = vsub.f32 %v3303_v48, %v3515_v47  ;;  %v4386_v54 = vsub.f32 0.6931472, %v3334_v52 }
 0x313   :  { %v2127_v50 = vsel %vm2126_vm2, %v2098_v37, 0.0  ;;  %v1786_v51 = vsel %vm1785_vm4, %v1783_v38, %v1780_v6  ;;  %2577 = vtanh.f32 %v3541_v3  ;;  %v3580_v13 = vmul.f32 %v2558_v35, %v4387_v10  ;;  %v4393_v6 = vld [vmem:[#allocation14_spill] sm:$0xff] }
 0x314   :  { %2153 = vadd.xlane.f32.xlu0 %v2127_v50  ;;  %v2047_v57 = vsub.f32 %v4386_v54, %v1995_v14  ;;  %v3583_v36 = vmul.f32 %v2562_v1, %v4388_v43  ;;  %v3585_v18 = vadd.f32 -0.9189385, %v1563_v60  ;;  %v4389_v28 = vmax.f32 %v3384_v25, 0.0 }
 0x315   :  { %v3595_v52 = vadd.f32 %v3493_v39, %v3209_v21  ;;  %v1372_v45 = vmul.f32 1.442695, %v1332_v0  ;;  %v1333_v24 = vmin.f32 %v1307_v30, 2.0  ;;  %v3597_v9 = vadd.f32 -0.9189385, %v1564_v12  ;;  %v4394_v12 = vld [vmem:[#allocation22_spill] sm:$0xff] }
 0x316   :  { %v1996_v48 = vadd.f32 %v1786_v51, %v4389_v28  ;;  %v3591_v47 = vpop.eup %2567  ;;  %v2073_v37 = vmul.f32 2.0, %v2047_v57  ;;  %v3601_v1 = vadd.f32 %v3512_v61, %v3209_v21  ;;  %v1308_v15 = vmax.f32 %v1246_v11, -20.0  ;;  %v4400_v57 = vld [vmem:[#allocation17_spill] sm:$0xff] }
 0x317   :  { %v3587_v63 = vpop.f32.mrb[68].mxu0  ;;  %4390 = vst [vmem:[#allocation12_spill] sm:$0xff] %v3597_v9  ;;  %v3606_v25 = vmul.f32 -2.0, %v3541_v3  ;;  %v3608_v23 = vadd.f32 -0.9189385, %v1565_v34  ;;  %v1250_v39 = vadd.f32 %v1249_v56, %v3163_v42  ;;  %v2570_v14 = vpop.eup %2569  ;;  %v3615_v61 = vmul.f32 %v2566_v26, %v4393_v6  ;;  %v4396_v6 = vld [vmem:[#allocation15_spill] sm:$0xff] }
 0x318   :  { %v1255_v35 = vpop.f32.mrb[69].mxu0  ;;  %v2099_v30 = vsub.f32 %v3386_v20, %v2073_v37  ;;  %v4392_v50 = vsub.f32 0.6931472, %v3353_v62  ;;  %v1566_v11 = vsub.f32 %v4394_v12, %v1332_v0  ;;  %v1787_v54 = vadd.f32 1.0, %v3591_v47  ;;  %v2572_v34 = vpop.eup %2571  ;;  %v4395_v0 = vld [vmem:[#allocation25_spill] sm:$0xff] }
 0x319   :  { %v3603_v60 = vpop.f32.mrb[70].mxu0  ;;  %4391 = vst [vmem:[#allocation13_spill] sm:$0xff] %v3608_v23  ;;  %2579 = vpow2.f32 %v1372_v45  ;;  %v1374_v51 = vmul.f32 1.442695, %v1333_v24  ;;  %v2574_v10 = vpop.eup %2573  ;;  %v1334_v62 = vmin.f32 %v1308_v15, 2.0  ;;  %v1256_v43 = vadd.f32 %v1255_v35, %v3163_v42 }
 0x31a   :  { %v1259_v38 = vpop.f32.mrb[71].mxu0  ;;  %v2048_v46 = vsub.f32 %v4392_v50, %v1996_v48  ;;  %v2128_v20 = vsel %vm2126_vm2, %v2099_v30, 0.0  ;;  %2581 = vlog2.f32 %v1787_v54  ;;  %v1661_v26 = vand.u32 2147483647, %v3606_v25 }
 0x31b   :  { %2155 = vadd.xlane.f32.xlu0 %v2128_v20  ;;  %v1567_v28 = vsub.f32 %v4395_v0, %v1333_v24  ;;  %v1309_v48 = vmax.f32 %v1250_v39, -20.0  ;;  %v3630_v30 = vmul.f32 %v2570_v14, %v4396_v6  ;;  %v3634_v15 = vadd.f32 %v3537_v17, %v3209_v21 }
 0x31c   :  { %v2074_v56 = vmul.f32 2.0, %v2048_v46  ;;  %v3627_v50 = vpop.eup %2575  ;;  %v1260_v35 = vadd.f32 %v1259_v38, %v3163_v42  ;;  %v3641_v24 = vadd.f32 %v3505_v44, %v3418_v8  ;;  %v3643_v39 = vadd.f32 -0.9189385, %v1566_v11 }
 0x31d   :  { %v3647_v12 = vadd.f32 %v3552_v7, %v3209_v21  ;;  %v1790_v54 = vmul.f32 -0.5, %v3591_v47  ;;  %2583 = vpow2.f32 %v1374_v51  ;;  %v1376_v38 = vmul.f32 1.442695, %v1334_v62 }
 0x31e   :  { %v2100_v37 = vsub.f32 %v3403_v29, %v2074_v56  ;;  %v2578_v29 = vpop.eup %2577  ;;  %4397 = vst [vmem:[#allocation14_spill] sm:$0xff] %v3643_v39  ;;  %v1310_v20 = vmax.f32 %v1256_v43, -20.0  ;;  %v1687_v8 = vsub.f32 0.0, %v1661_v26  ;;  %v3654_v44 = vadd.f32 -0.9189385, %v1567_v28 }
 0x31f   :  { %v3637_v46 = vpop.f32.mrb[72].mxu0  ;;  %2210 = vst [vmem:[#allocation8 + $0x50] sm:$0xff] %v2578_v29  ;;  %v1568_v11 = vsub.f32 %v3351_v32, %v1334_v62  ;;  %v1335_v7 = vmin.f32 %v1309_v48, 2.0  ;;  %v1796_v6 = vadd.f32 1.0, %v3627_v50  ;;  %v3662_v51 = vmul.f32 %v2574_v10, %v4400_v57 }
 0x320   :  { %v2129_v14 = vsel %vm2126_vm2, %v2100_v37, 0.0  ;;  %v1265_v17 = vpop.f32.mrb[73].mxu0  ;;  %4398 = vst [vmem:[#allocation22_spill] sm:$0xff] %v3654_v44  ;;  %v4399_v37 = vld [vmem:[#allocation16_spill] sm:$0xff]  ;;  %v1311_v43 = vmax.f32 %v1260_v35, -20.0  ;;  %v3667_v26 = vadd.f32 %v3587_v63, %v3209_v21  ;;  %v1791_v28 = vadd.f32 1.0, %v1790_v54 }
 0x321   :  { %2157 = vadd.xlane.f32.xlu1 %v2129_v14  ;;  %v3652_v56 = vpop.f32.mrb[74].mxu0  ;;  %v3659_v45 = vmul.f32 %v2572_v34, %v4399_v37  ;;  %v1266_v14 = vadd.f32 %v1265_v17, %v3163_v42  ;;  %2585 = vlog2.f32 %v1796_v6  ;;  %v3670_v62 = vmin.f32 %v1310_v20, 2.0 }
 0x322   :  { %v1269_v0 = vpop.f32.mrb[75].mxu0  ;;  %2587 = vpow2.f32 %v1376_v38  ;;  %v1793_v34 = vand.u32 2147483647, %v3591_v47  ;;  %v1718_v48 = vmul.f32 1.442695, %v1687_v8  ;;  %v1569_v35 = vsub.f32 %v3361_v27, %v1335_v7 }
 0x323   :  { %v1270_v32 = vadd.f32 %v1269_v0, %v3163_v42  ;;  %v2580_v29 = vpop.eup %2579  ;;  %v3673_v57 = vadd.f32 -0.9189385, %v1568_v11  ;;  %v1378_v10 = vmul.f32 1.442695, %v1335_v7  ;;  %2589 = vtanh.f32 %v3641_v24 }
 0x324   :  { %v2582_v63 = vpop.eup %2581  ;;  %v3677_v17 = vmin.f32 %v1311_v43, 2.0  ;;  %v1312_v54 = vmax.f32 %v1266_v14, -20.0  ;;  %v1799_v0 = vmul.f32 -0.5, %v3627_v50  ;;  %2591 = vpow2.f32 %v1718_v48  ;;  %v4403_v48 = vld [vmem:[#allocation18_spill] sm:$0xff] }
 0x325   :  { %4401 = vst [vmem:[#allocation25_spill] sm:$0xff] %v3673_v57  ;;  %v1789_v20 = vmul.f32 0.6931472, %v2582_v63  ;;  %v1792_v8 = vmul.f32 %v3591_v47, %v1791_v28  ;;  %v1313_v6 = vmax.f32 %v1270_v32, -20.0  ;;  %v3684_v37 = vmul.f32 -2.0, %v3641_v24 }
 0x326   :  { %4402 = vst [vmem:[#allocation15_spill] sm:$0xff] %v3677_v17  ;;  %v1380_v27 = vmul.f32 1.442695, %v3670_v62  ;;  %v3689_v7 = vadd.f32 %v3603_v60, %v3209_v21  ;;  %vm1794_vm5 = vcmp.lt.f32.partialorder %v1793_v34, 0.0004427343  ;;  %v3695_v63 = vmul.f32 %v2580_v29, %v4403_v48 }
 0x327   :  { %v3680_v38 = vpop.f32.mrb[76].mxu0  ;;  %2593 = vpow2.f32 %v1378_v10  ;;  %v3697_v47 = vadd.f32 -0.9189385, %v1569_v35  ;;  %v1795_v28 = vsel %vm1794_vm5, %v1792_v8, %v1789_v20  ;;  %v2584_v57 = vpop.eup %2583  ;;  %v1382_v44 = vmul.f32 1.442695, %v3677_v17  ;;  %v4408_v8 = vld [vmem:[#allocation19_spill] sm:$0xff] }
 0x328   :  { %v1275_v11 = vpop.f32.mrb[77].mxu0  ;;  %v3700_v39 = vmin.f32 %v1312_v54, 2.0  ;;  %v4405_v60 = vmax.f32 %v3461_v41, 0.0  ;;  %v1800_v23 = vadd.f32 1.0, %v1799_v0  ;;  %v3704_v43 = vmin.f32 %v1313_v6, 2.0 }
 0x329   :  { %v3692_v14 = vpop.f32.mrb[78].mxu0  ;;  %4404 = vst [vmem:[#allocation16_spill] sm:$0xff] %v3697_v47  ;;  %v1802_v9 = vand.u32 2147483647, %v3627_v50  ;;  %v1662_v29 = vand.u32 2147483647, %v3684_v37  ;;  %v3710_v10 = vadd.f32 %v3522_v22, %v3434_v59  ;;  %2595 = vpow2.f32 %v1380_v27 }
 0x32a   :  { %v1279_v32 = vpop.f32.mrb[79].mxu0  ;;  %v1997_v34 = vadd.f32 %v1795_v28, %v4405_v60  ;;  %4406 = vst [vmem:[#allocation17_spill] sm:$0xff] %v3704_v43  ;;  %v4407_v35 = vsub.f32 0.6931472, %v3399_v2  ;;  %v1276_v54 = vadd.f32 %v1275_v11, %v3163_v42  ;;  %v3717_v41 = vadd.f32 %v3580_v13, %v3444_v4 }
 0x32b   :  { %v2586_v0 = vpop.eup %2585  ;;  %v3720_v6 = vmul.f32 %v2584_v57, %v4408_v8  ;;  %v1280_v48 = vadd.f32 %v1279_v32, %v3163_v42  ;;  %v1688_v28 = vsub.f32 0.0, %v1662_v29  ;;  %2597 = vtanh.f32 %v3710_v10 }
 0x32c   :  { %v2049_v20 = vsub.f32 %v4407_v35, %v1997_v34  ;;  %v2588_v59 = vpop.eup %2587  ;;  %v1384_v22 = vmul.f32 1.442695, %v3700_v39  ;;  %v1798_v27 = vmul.f32 0.6931472, %v2586_v0  ;;  %v1801_v11 = vmul.f32 %v3627_v50, %v1800_v23 }
 0x32d   :  { %v2590_v4 = vpop.eup %2589  ;;  %v1570_v13 = vsub.f32 %v3365_v49, %v3670_v62  ;;  %2599 = vpow2.f32 %v1382_v44  ;;  %v1386_v57 = vmul.f32 1.442695, %v3704_v43  ;;  %vm1803_vm6 = vcmp.lt.f32.partialorder %v1802_v9, 0.0004427343  ;;  %v4421_v43 = vld [vmem:[#allocation23_spill] sm:$0xff] }
 0x32e   :  { %v2075_v2 = vmul.f32 2.0, %v2049_v20  ;;  %v3731_v32 = vpop.eup %2591  ;;  %v1804_v29 = vsel %vm1803_vm6, %v1801_v11, %v1798_v27  ;;  %v1314_v35 = vmax.f32 %v1276_v54, -20.0  ;;  %2211 = vst [vmem:[#allocation8 + $0x60] sm:$0xff] %v2590_v4  ;;  %v3735_v20 = vmul.f32 -2.0, %v3710_v10 }
 0x32f   :  { %v3726_v60 = vpop.f32.mrb[80].mxu0  ;;  %v4409_v50 = vmax.f32 %v3502_v55, 0.0  ;;  %v1805_v49 = vadd.f32 1.0, %v3731_v32  ;;  %v1315_v44 = vmax.f32 %v1280_v48, -20.0  ;;  %v1720_v62 = vmul.f32 1.442695, %v1688_v28 }
 0x330   :  { %v2101_v34 = vsub.f32 %v3410_v33, %v2075_v2  ;;  %v1285_v23 = vpop.f32.mrb[81].mxu0  ;;  %v3746_v33 = vadd.f32 %v3637_v46, %v3209_v21  ;;  %2601 = vpow2.f32 %v1384_v22  ;;  %v3750_v27 = vadd.f32 -0.9189385, %v1570_v13 }
 0x331   :  { %v1998_v0 = vadd.f32 %v1804_v29, %v4409_v50  ;;  %v3740_v8 = vpop.f32.mrb[82].mxu0  ;;  %v2594_v55 = vpop.eup %2593  ;;  %v3754_v48 = vadd.f32 %v3652_v56, %v3209_v21  ;;  %v4412_v28 = vsub.f32 0.6931472, %v3405_v31  ;;  %2603 = vlog2.f32 %v1805_v49  ;;  %v4415_v50 = vld [vmem:[#allocation20_spill] sm:$0xff] }
 0x332   :  { %4410 = vst [vmem:[#allocation18_spill] sm:$0xff] %v3740_v8  ;;  %v2130_v54 = vsel %vm2126_vm2, %v2101_v34, 0.0  ;;  %v1289_v2 = vpop.f32.mrb[83].mxu0  ;;  %4411 = vst [vmem:[#allocation19_spill] sm:$0xff] %v3750_v27  ;;  %v3759_v46 = vmul.f32 %v2588_v59, %v3287_v16  ;;  %2605 = vpow2.f32 %v1386_v57  ;;  %v3761_v22 = vmin.f32 %v1314_v35, 2.0  ;;  %v4416_v57 = vld [vmem:[#allocation30_spill] sm:$0xff] }
 0x333   :  { %2159 = vadd.xlane.f32.xlu1 %v2130_v54  ;;  %v2050_v11 = vsub.f32 %v4412_v28, %v1998_v0  ;;  %v1663_v4 = vand.u32 2147483647, %v3735_v20  ;;  %v3765_v29 = vmin.f32 %v1315_v44, 2.0  ;;  %2607 = vpow2.f32 %v1720_v62  ;;  %v2596_v56 = vpop.eup %2595 }
 0x334   :  { %4413 = vst [vmem:[#allocation39_spill] sm:$0xff] %v3761_v22  ;;  %v3768_v54 = vmul.f32 %v2594_v55, %v4415_v50  ;;  %v1808_v31 = vmul.f32 -0.5, %v3731_v32  ;;  %v1286_v16 = vadd.f32 %v1285_v23, %v3163_v42  ;;  %v3775_v49 = vadd.f32 %v3680_v38, %v3209_v21  ;;  %v4417_v23 = vld [vmem:[#allocation34_spill] sm:$0xff] }
 0x335   :  { %v2076_v34 = vmul.f32 2.0, %v2050_v11  ;;  %4414 = vst [vmem:[#allocation40_spill] sm:$0xff] %v3765_v29  ;;  %v1689_v0 = vsub.f32 0.0, %v1663_v4  ;;  %v2598_v59 = vpop.eup %2597  ;;  %2609 = vtanh.f32 %v3717_v41  ;;  %v3779_v44 = vmul.f32 -2.0, %v3717_v41 }
 0x336   :  { %v1388_v62 = vmul.f32 1.442695, %v3761_v22  ;;  %v3784_v55 = vadd.f32 %v3692_v14, %v3209_v21  ;;  %2212 = vst [vmem:[#allocation8 + $0x70] sm:$0xff] %v2598_v59  ;;  %v3788_v11 = vadd.f32 %v3583_v36, %v4417_v23  ;;  %v1316_v50 = vmax.f32 %v1286_v16, -20.0  ;;  %v4418_v23 = vld [vmem:[#allocation35_spill] sm:$0xff] }
 0x337   :  { %v2102_v35 = vsub.f32 %v4416_v57, %v2076_v34  ;;  %v1722_v28 = vmul.f32 1.442695, %v1689_v0  ;;  %v2600_v4 = vpop.eup %2599  ;;  %v1390_v34 = vmul.f32 1.442695, %v3765_v29  ;;  %v1664_v57 = vand.u32 2147483647, %v3779_v44 }
 0x338   :  { %v1809_v9 = vadd.f32 1.0, %v1808_v31  ;;  %v1811_v14 = vand.u32 2147483647, %v3731_v32  ;;  %v3796_v0 = vmul.f32 -2.0, %v3788_v11  ;;  %v1290_v36 = vadd.f32 %v1289_v2, %v3163_v42  ;;  %v4419_v29 = vld [vmem:[#allocation21_spill] sm:$0xff] }
 0x339   :  { %v2131_v38 = vsel %vm2126_vm2, %v2102_v35, 0.0  ;;  %2611 = vpow2.f32 %v1722_v28  ;;  %v1690_v59 = vsub.f32 0.0, %v1664_v57  ;;  %v3802_v35 = vadd.f32 %v3615_v61, %v4418_v23 }
 0x33a   :  { %2161 = vadd.xlane.f32.xlu0 %v2131_v38  ;;  %2613 = vtanh.f32 %v3788_v11  ;;  %v2602_v16 = vpop.eup %2601  ;;  %v1665_v28 = vand.u32 2147483647, %v3796_v0  ;;  %v3808_v22 = vmul.f32 %v2596_v56, %v4419_v29  ;;  %v3810_v42 = vmin.f32 %v1316_v50, 2.0  ;;  %v4422_v56 = vld [vmem:[#allocation24_spill] sm:$0xff] }
 0x33b   :  { %2615 = vpow2.f32 %v1388_v62  ;;  %v2604_v13 = vpop.eup %2603  ;;  %v1724_v2 = vmul.f32 1.442695, %v1690_v59  ;;  %v3813_v61 = vmul.f32 %v2600_v4, %v4421_v43  ;;  %v1810_v62 = vmul.f32 %v3731_v32, %v1809_v9 }
 0x33c   :  { %2617 = vpow2.f32 %v1390_v34  ;;  %4420 = vst [vmem:[#allocation20_spill] sm:$0xff] %v3810_v42  ;;  %v2606_v57 = vpop.eup %2605  ;;  %v1807_v23 = vmul.f32 0.6931472, %v2604_v13  ;;  %v1691_v38 = vsub.f32 0.0, %v1665_v28  ;;  %vm1812_vm7 = vcmp.lt.f32.partialorder %v1811_v14, 0.0004427343 }
 0x33d   :  { %v3816_v17 = vpop.eup %2607  ;;  %v1317_v58 = vmax.f32 %v1290_v36, -20.0  ;;  %v3820_v29 = vmul.f32 -2.0, %v3802_v35  ;;  %v3823_v34 = vmul.f32 %v2602_v16, %v4422_v56  ;;  %v4423_v32 = vmax.f32 %v3606_v25, 0.0  ;;  %v4424_v36 = vld [vmem:[#allocation26_spill] sm:$0xff]  ;;  %v4427_v25 = vld [vmem:[#allocation37_spill] sm:$0xff] }
 0x33e   :  { %v1813_v50 = vsel %vm1812_vm7, %v1810_v62, %v1807_v23  ;;  %v1814_v43 = vadd.f32 1.0, %v3816_v17  ;;  %v1392_v14 = vmul.f32 1.442695, %v3810_v42  ;;  %2619 = vpow2.f32 %v1724_v2 }
 0x33f   :  { %v2610_v4 = vpop.eup %2609  ;;  %v1999_v9 = vadd.f32 %v1813_v50, %v4423_v32  ;;  %v1726_v59 = vmul.f32 1.442695, %v1691_v38  ;;  %v3831_v28 = vmul.f32 %v2606_v57, %v4424_v36  ;;  %v1666_v23 = vand.u32 2147483647, %v3820_v29 }
 0x340   :  { %2621 = vlog2.f32 %v1814_v43  ;;  %2213 = vst [vmem:[#allocation8 + $0x80] sm:$0xff] %v2610_v4  ;;  %v4425_v62 = vsub.f32 0.6931472, %v3541_v3  ;;  %v3837_v31 = vmin.f32 %v1317_v58, 2.0  ;;  %v3841_v50 = vadd.f32 %v3630_v30, %v4427_v25 }
 0x341   :  { %2623 = vpow2.f32 %v1726_v59  ;;  %v1817_v2 = vmul.f32 -0.5, %v3816_v17  ;;  %v1692_v57 = vsub.f32 0.0, %v1666_v23  ;;  %v3849_v43 = vadd.f32 %v3659_v45, %v3545_v19  ;;  %v4428_v19 = vld [vmem:[#allocation31_spill] sm:$0xff] }
 0x342   :  { %v2051_v56 = vsub.f32 %v4425_v62, %v1999_v9  ;;  %4426 = vst [vmem:[#allocation30_spill] sm:$0xff] %v3837_v31  ;;  %2625 = vtanh.f32 %v3802_v35  ;;  %v3856_v36 = vmul.f32 -2.0, %v3841_v50  ;;  %v1820_v62 = vand.u32 2147483647, %v3816_v17 }
 0x343   :  { %v3843_v38 = vpop.eup %2611  ;;  %2627 = vpow2.f32 %v1392_v14  ;;  %v1728_v59 = vmul.f32 1.442695, %v1692_v57  ;;  %v1394_v14 = vmul.f32 1.442695, %v3837_v31  ;;  %v1818_v25 = vadd.f32 1.0, %v1817_v2 }
 0x344   :  { %v2614_v3 = vpop.eup %2613  ;;  %v2077_v4 = vmul.f32 2.0, %v2051_v56  ;;  %v1823_v58 = vadd.f32 1.0, %v3843_v38  ;;  %2629 = vtanh.f32 %v3841_v50  ;;  %v3861_v56 = vld [vmem:[#allocation2 + $0xb0] sm:$0xff]  ;;  %v3865_v57 = vmul.f32 -2.0, %v3849_v43 }
 0x345   :  { %v2616_v30 = vpop.eup %2615  ;;  %2214 = vst [vmem:[#allocation8 + $0x90] sm:$0xff] %v2614_v3  ;;  %4429 = vst [vmem:[#allocation34_spill] sm:$0xff] %v3861_v56  ;;  %v1667_v3 = vand.u32 2147483647, %v3856_v36  ;;  %vm3896_vm8 = vcmp.lt.f32.partialorder %v1820_v62, 0.0004427343 }
 0x346   :  { %v2618_v23 = vpop.eup %2617  ;;  %v2103_v45 = vsub.f32 %v4428_v19, %v2077_v4  ;;  %2631 = vlog2.f32 %v1823_v58  ;;  %v3870_v16 = vmul.f32 %v2616_v30, %v3861_v56  ;;  %v3872_v4 = vld [vmem:[#allocation2 + $0xb8] sm:$0xff]  ;;  %v1668_v32 = vand.u32 2147483647, %v3865_v57 }
 0x347   :  { %2633 = vpow2.f32 %v1728_v59  ;;  %4430 = vst [vmem:[#allocation35_spill] sm:$0xff] %v3872_v4  ;;  %v3877_v2 = vmul.f32 %v2618_v23, %v3872_v4  ;;  %v1826_v59 = vmul.f32 -0.5, %v3843_v38  ;;  %v1693_v19 = vsub.f32 0.0, %v1667_v3 }
 0x348   :  { %v2132_v9 = vsel %vm2126_vm2, %v2103_v45, 0.0  ;;  %2635 = vtanh.f32 %v3849_v43  ;;  %v3881_v13 = vpop.eup %2619  ;;  %v3885_v30 = vadd.f32 %v3662_v51, %v3564_v40  ;;  %v3889_v45 = vadd.f32 %v3695_v63, %v3595_v52 }
 0x349   :  { %2163 = vadd.xlane.f32.xlu1 %v2132_v9  ;;  %2637 = vpow2.f32 %v1394_v14  ;;  %v3893_v9 = vadd.f32 %v3720_v6, %v3601_v1  ;;  %v1819_v3 = vmul.f32 %v3816_v17, %v1818_v25  ;;  %v1832_v14 = vadd.f32 1.0, %v3881_v13 }
 0x34a   :  { %v2622_v23 = vpop.eup %2621  ;;  %v1730_v31 = vmul.f32 1.442695, %v1693_v19  ;;  %v1694_v42 = vsub.f32 0.0, %v1668_v32  ;;  %2639 = vtanh.f32 %v3885_v30  ;;  %v3905_v52 = vmul.f32 -2.0, %v3885_v30 }
 0x34b   :  { %v3901_v40 = vpop.eup %2623  ;;  %v1816_v51 = vmul.f32 0.6931472, %v2622_v23  ;;  %v1827_v63 = vadd.f32 1.0, %v1826_v59  ;;  %2641 = vlog2.f32 %v1832_v14  ;;  %v1829_v19 = vand.u32 2147483647, %v3843_v38 }
 0x34c   :  { %v2626_v1 = vpop.eup %2625  ;;  %v1841_v17 = vadd.f32 1.0, %v3901_v40  ;;  %v1835_v32 = vmul.f32 -0.5, %v3881_v13  ;;  %2643 = vpow2.f32 %v1730_v31  ;;  %v4434_v4 = vmax.f32 %v3684_v37, 0.0 }
 0x34d   :  { %v3909_v62 = vpop.eup %2627  ;;  %v1822_v25 = vsel %vm3896_vm8, %v1819_v3, %v1816_v51  ;;  %2215 = vst [vmem:[#allocation8 + $0xa0] sm:$0xff] %v2626_v1  ;;  %v1732_v27 = vmul.f32 1.442695, %v1694_v42  ;;  %v1838_v56 = vand.u32 2147483647, %v3881_v13  ;;  %v1844_v58 = vmul.f32 -0.5, %v3901_v40 }
 0x34e   :  { %4433 = vst [vmem:[#allocation21_spill] sm:$0xff] %v3909_v62  ;;  %v2630_v23 = vpop.eup %2629  ;;  %v2000_v59 = vadd.f32 %v1822_v25, %v4434_v4  ;;  %2645 = vlog2.f32 %v1841_v17  ;;  %v1669_v51 = vand.u32 2147483647, %v3905_v52  ;;  %v4435_v31 = vsub.f32 0.6931472, %v3641_v24 }
 0x34f   :  { %2216 = vst [vmem:[#allocation8 + $0xb0] sm:$0xff] %v2630_v23  ;;  %v1828_v17 = vmul.f32 %v3843_v38, %v1827_v63  ;;  %2647 = vpow2.f32 %v1732_v27  ;;  %vm1830_vm9 = vcmp.lt.f32.partialorder %v1829_v19, 0.0004427343  ;;  %v1836_v25 = vadd.f32 1.0, %v1835_v32  ;;  %v4440_v63 = vld [vmem:[#allocation32_spill] sm:$0xff] }
 0x350   :  { %v2632_v6 = vpop.eup %2631  ;;  %v2052_v37 = vsub.f32 %v4435_v31, %v2000_v59  ;;  %v1695_v8 = vsub.f32 0.0, %v1669_v51  ;;  %2649 = vtanh.f32 %v3889_v45  ;;  %v4437_v24 = vmax.f32 %v3735_v20, 0.0 }
 0x351   :  { %v3922_v1 = vpop.eup %2633  ;;  %v1825_v4 = vmul.f32 0.6931472, %v2632_v6  ;;  %vm3934_vm10 = vcmp.lt.f32.partialorder %v1838_v56, 0.0004427343  ;;  %v1845_v38 = vadd.f32 1.0, %v1844_v58  ;;  %v3941_v51 = vmul.f32 -2.0, %v3889_v45 }
 0x352   :  { %v2636_v42 = vpop.eup %2635  ;;  %v1850_v14 = vadd.f32 1.0, %v3922_v1  ;;  %v2078_v3 = vmul.f32 2.0, %v2052_v37  ;;  %v1853_v32 = vmul.f32 -0.5, %v3922_v1  ;;  %v1734_v59 = vmul.f32 1.442695, %v1695_v8 }
 0x353   :  { %v1831_v23 = vsel %vm1830_vm9, %v1828_v17, %v1825_v4  ;;  %2217 = vst [vmem:[#allocation8 + $0xc0] sm:$0xff] %v2636_v42  ;;  %v3930_v62 = vpop.eup %2637  ;;  %v4441_v37 = vsub.f32 0.6931472, %v3710_v10  ;;  %v1847_v20 = vand.u32 2147483647, %v3901_v40  ;;  %v3948_v56 = vmul.f32 -2.0, %v3893_v9 }
 0x354   :  { %4436 = vst [vmem:[#allocation23_spill] sm:$0xff] %v3930_v62  ;;  %v2001_v6 = vadd.f32 %v1831_v23, %v4437_v24  ;;  %2651 = vlog2.f32 %v1850_v14  ;;  %v2104_v19 = vsub.f32 %v4440_v63, %v2078_v3  ;;  %v2640_v31 = vpop.eup %2639  ;;  %v1837_v8 = vmul.f32 %v3881_v13, %v1836_v25  ;;  %v4442_v62 = vld [vmem:[#allocation33_spill] sm:$0xff] }
 0x355   :  { %2653 = vtanh.f32 %v3893_v9  ;;  %v2642_v14 = vpop.eup %2641  ;;  %2218 = vst [vmem:[#allocation8 + $0xd0] sm:$0xff] %v2640_v31  ;;  %v1670_v3 = vand.u32 2147483647, %v3941_v51  ;;  %v1846_v23 = vmul.f32 %v3901_v40, %v1845_v38  ;;  %v1671_v24 = vand.u32 2147483647, %v3948_v56 }
 0x356   :  { %v2053_v4 = vsub.f32 %v4441_v37, %v2001_v6  ;;  %v2133_v58 = vsel %vm2126_vm2, %v2104_v19, 0.0  ;;  %2655 = vpow2.f32 %v1734_v59  ;;  %v2644_v17 = vpop.eup %2643  ;;  %v1834_v42 = vmul.f32 0.6931472, %v2642_v14 }
 0x357   :  { %2165 = vadd.xlane.f32.xlu0 %v2133_v58  ;;  %v1854_v63 = vadd.f32 1.0, %v1853_v32  ;;  %v1856_v37 = vand.u32 2147483647, %v3922_v1  ;;  %v1859_v47 = vadd.f32 1.0, %v2644_v17  ;;  %v1696_v19 = vsub.f32 0.0, %v1670_v3 }
 0x358   :  { %v2079_v10 = vmul.f32 2.0, %v2053_v4  ;;  %v2646_v6 = vpop.eup %2645  ;;  %v1840_v25 = vsel %vm3934_vm10, %v1837_v8, %v1834_v42  ;;  %v1697_v31 = vsub.f32 0.0, %v1671_v24  ;;  %v4443_v4 = vmax.f32 %v3779_v44, 0.0 }
 0x359   :  { %v1843_v59 = vmul.f32 0.6931472, %v2646_v6  ;;  %v3960_v58 = vpop.eup %2647  ;;  %vm1848_vm11 = vcmp.lt.f32.partialorder %v1847_v20, 0.0004427343  ;;  %2657 = vlog2.f32 %v1859_v47  ;;  %v1642_v38 = vmax.f32 %v3865_v57, 0.0 }
 0x35a   :  { %v2105_v13 = vsub.f32 %v4442_v62, %v2079_v10  ;;  %v2002_v40 = vadd.f32 %v1840_v25, %v4443_v4  ;;  %v1862_v3 = vmul.f32 -0.5, %v2644_v17  ;;  %v1868_v62 = vadd.f32 1.0, %v3960_v58  ;;  %v2650_v27 = vpop.eup %2649 }
 0x35b   :  { %v1849_v14 = vsel %vm1848_vm11, %v1846_v23, %v1843_v59  ;;  %v4444_v8 = vsub.f32 0.6931472, %v3717_v41  ;;  %v4445_v42 = vmax.f32 %v3796_v0, 0.0  ;;  %vm3972_vm12 = vcmp.lt.f32.partialorder %v1856_v37, 0.0004427343  ;;  %2219 = vst [vmem:[#allocation8 + $0xe0] sm:$0xff] %v2650_v27 }
 0x35c   :  { %v2134_v32 = vsel %vm2126_vm2, %v2105_v13, 0.0  ;;  %v2032_v47 = vsub.f32 0.6931472, %v3849_v43  ;;  %v1855_v23 = vmul.f32 %v3922_v1, %v1854_v63  ;;  %2659 = vlog2.f32 %v1868_v62  ;;  %v4449_v63 = vld [vmem:[#allocation36_spill] sm:$0xff] }
 0x35d   :  { %2167 = vadd.xlane.f32.xlu1 %v2134_v32  ;;  %v2054_v10 = vsub.f32 %v4444_v8, %v2002_v40  ;;  %v2003_v44 = vadd.f32 %v1849_v14, %v4445_v42  ;;  %v1736_v6 = vmul.f32 1.442695, %v1696_v19  ;;  %v1738_v13 = vmul.f32 1.442695, %v1697_v31 }
 0x35e   :  { %v2652_v24 = vpop.eup %2651  ;;  %v4448_v41 = vsub.f32 0.6931472, %v3788_v11  ;;  %v1865_v0 = vand.u32 2147483647, %v2644_v17  ;;  %v1863_v37 = vadd.f32 1.0, %v1862_v3  ;;  %v1871_v32 = vmul.f32 -0.5, %v3960_v58 }
 0x35f   :  { %v2080_v25 = vmul.f32 2.0, %v2054_v10  ;;  %v1852_v4 = vmul.f32 0.6931472, %v2652_v24  ;;  %v2654_v40 = vpop.eup %2653  ;;  %2661 = vpow2.f32 %v1736_v6  ;;  %v3983_v14 = vadd.f32 %v3759_v46, %v3634_v15  ;;  %v4451_v10 = vld [vmem:[#allocation38_spill] sm:$0xff] }
 0x360   :  { %v2055_v59 = vsub.f32 %v4448_v41, %v2003_v44  ;;  %v3985_v1 = vpop.eup %2655  ;;  %2663 = vpow2.f32 %v1738_v13  ;;  %2220 = vst [vmem:[#allocation8 + $0xf0] sm:$0xff] %v2654_v40  ;;  %v4450_v62 = vmax.f32 %v3820_v29, 0.0  ;;  %v1643_v27 = vmax.f32 %v3905_v52, 0.0 }
 0x361   :  { %v2106_v19 = vsub.f32 %v4449_v63, %v2080_v25  ;;  %v1858_v11 = vsel %vm3972_vm12, %v1855_v23, %v1852_v4  ;;  %v1877_v8 = vadd.f32 1.0, %v3985_v1  ;;  %v2033_v15 = vsub.f32 0.6931472, %v3885_v30 }
 0x362   :  { %v2081_v31 = vmul.f32 2.0, %v2055_v59  ;;  %v2004_v3 = vadd.f32 %v1858_v11, %v4450_v62  ;;  %2665 = vtanh.f32 %v3983_v14  ;;  %v4000_v44 = vmul.f32 -2.0, %v3983_v14 }
 0x363   :  { %v2135_v46 = vsel %vm2126_vm2, %v2106_v19, 0.0  ;;  %v4452_v29 = vsub.f32 0.6931472, %v3802_v35  ;;  %v1864_v24 = vmul.f32 %v2644_v17, %v1863_v37  ;;  %vm4004_vm13 = vcmp.lt.f32.partialorder %v1865_v0, 0.0004427343  ;;  %v2658_v6 = vpop.eup %2657 }
 0x364   :  { %v2107_v42 = vsub.f32 %v4451_v10, %v2081_v31  ;;  %2169 = vadd.xlane.f32.xlu0 %v2135_v46  ;;  %2667 = vlog2.f32 %v1877_v8  ;;  %v1872_v25 = vadd.f32 1.0, %v1871_v32  ;;  %v1874_v41 = vand.u32 2147483647, %v3960_v58 }
 0x365   :  { %v2056_v20 = vsub.f32 %v4452_v29, %v2004_v3  ;;  %v1672_v59 = vand.u32 2147483647, %v4000_v44  ;;  %v1861_v40 = vmul.f32 0.6931472, %v2658_v6  ;;  %v1880_v35 = vmul.f32 -0.5, %v3985_v1 }
 0x366   :  { %v2136_v13 = vsel %vm2126_vm2, %v2107_v42, 0.0  ;;  %v4015_v17 = vadd.f32 %v3768_v54, %v3647_v12  ;;  %v4019_v37 = vadd.f32 %v3808_v22, %v3667_v26  ;;  %v4023_v32 = vadd.f32 %v3813_v61, %v3689_v7  ;;  %v2660_v19 = vpop.eup %2659 }
 0x367   :  { %2171 = vadd.xlane.f32.xlu1 %v2136_v13  ;;  %v2082_v4 = vmul.f32 2.0, %v2056_v20  ;;  %v1698_v0 = vsub.f32 0.0, %v1672_v59  ;;  %v4027_v63 = vadd.f32 %v3823_v34, %v3746_v33  ;;  %v1867_v12 = vsel %vm4004_vm13, %v1864_v24, %v1861_v40 }
 0x368   :  { %2669 = vtanh.f32 %v4015_v17  ;;  %v4034_v54 = vmul.f32 -2.0, %v4015_v17  ;;  %v4455_v26 = vmax.f32 %v3856_v36, 0.0  ;;  %v1870_v7 = vmul.f32 0.6931472, %v2660_v19 }
 0x369   :  { %v2108_v31 = vsub.f32 %v3556_v5, %v2082_v4  ;;  %v1873_v61 = vmul.f32 %v3960_v58, %v1872_v25  ;;  %vm1875_vm14 = vcmp.lt.f32.partialorder %v1874_v41, 0.0004427343  ;;  %v2662_v33 = vpop.eup %2661  ;;  %v1881_v5 = vadd.f32 1.0, %v1880_v35 }
 0x36a   :  { %v2005_v22 = vadd.f32 %v1867_v12, %v4455_v26  ;;  %v1883_v11 = vand.u32 2147483647, %v3985_v1  ;;  %2671 = vtanh.f32 %v4019_v37  ;;  %v2664_v62 = vpop.eup %2663  ;;  %v4456_v3 = vsub.f32 0.6931472, %v3841_v50 }
 0x36b   :  { %v2137_v34 = vsel %vm2126_vm2, %v2108_v31, 0.0  ;;  %v1876_v36 = vsel %vm1875_vm14, %v1873_v61, %v1870_v7  ;;  %v1886_v46 = vadd.f32 1.0, %v2662_v33  ;;  %v1889_v10 = vmul.f32 -0.5, %v2662_v33 }
 0x36c   :  { %2173 = vadd.xlane.f32.xlu0 %v2137_v34  ;;  %v2057_v8 = vsub.f32 %v4456_v3, %v2005_v22  ;;  %v2006_v58 = vadd.f32 %v1876_v36, %v1642_v38  ;;  %v1895_v42 = vadd.f32 1.0, %v2664_v62  ;;  %v1740_v29 = vmul.f32 1.442695, %v1698_v0  ;;  %v2666_v24 = vpop.eup %2665 }
 0x36d   :  { %v1673_v20 = vand.u32 2147483647, %v4034_v54  ;;  %v1644_v6 = vmax.f32 %v3941_v51, 0.0  ;;  %2673 = vlog2.f32 %v1886_v46  ;;  %v1898_v13 = vmul.f32 -0.5, %v2664_v62  ;;  %2221 = vst [vmem:[#allocation8 + $0x100] sm:$0xff] %v2666_v24  ;;  %v4125_v51 = vld [vmem:[#allocation2 + $0xc0] sm:$0xff] }
 0x36e   :  { %v2083_v23 = vmul.f32 2.0, %v2057_v8  ;;  %v2668_v25 = vpop.eup %2667  ;;  %v2058_v50 = vsub.f32 %v2032_v47, %v2006_v58  ;;  %v1882_v41 = vmul.f32 %v3985_v1, %v1881_v5  ;;  %vm4052_vm15 = vcmp.lt.f32.partialorder %v1883_v11, 0.0004427343 }
 0x36f   :  { %2675 = vlog2.f32 %v1895_v42  ;;  %v1879_v38 = vmul.f32 0.6931472, %v2668_v25  ;;  %v1890_v4 = vadd.f32 1.0, %v1889_v10  ;;  %v1892_v40 = vand.u32 2147483647, %v2662_v33 }
 0x370   :  { %v2109_v57 = vsub.f32 %v3585_v18, %v2083_v23  ;;  %v2084_v35 = vmul.f32 2.0, %v2058_v50  ;;  %v1901_v0 = vand.u32 2147483647, %v2664_v62  ;;  %2677 = vpow2.f32 %v1740_v29  ;;  %v4459_v18 = vld [vmem:[#allocation12_spill] sm:$0xff] }
 0x371   :  { %v1699_v19 = vsub.f32 0.0, %v1673_v20  ;;  %v1885_v47 = vsel %vm4052_vm15, %v1882_v41, %v1879_v38  ;;  %v1899_v1 = vadd.f32 1.0, %v1898_v13  ;;  %v4062_v31 = vmul.f32 -2.0, %v4019_v37  ;;  %v4464_v13 = vld [vmem:[#allocation13_spill] sm:$0xff] }
 0x372   :  { %v2138_v43 = vsel %vm2126_vm2, %v2109_v57, 0.0  ;;  %v2670_v12 = vpop.eup %2669  ;;  %v2110_v26 = vsub.f32 %v4459_v18, %v2084_v35  ;;  %v2007_v22 = vadd.f32 %v1885_v47, %v1643_v27  ;;  %2679 = vtanh.f32 %v4023_v32  ;;  %v4466_v18 = vld [vmem:[#allocation21_spill] sm:$0xff] }
 0x373   :  { %2175 = vadd.xlane.f32.xlu1 %v2138_v43  ;;  %v1742_v7 = vmul.f32 1.442695, %v1699_v19  ;;  %vm4068_vm0 = vcmp.lt.f32.partialorder %v1892_v40, 0.0004427343  ;;  %v1645_v34 = vmax.f32 %v3948_v56, 0.0  ;;  %2222 = vst [vmem:[#allocation8 + $0x110] sm:$0xff] %v2670_v12  ;;  %v1891_v36 = vmul.f32 %v2662_v33, %v1890_v4 }
 0x374   :  { %v1674_v5 = vand.u32 2147483647, %v4062_v31  ;;  %v4075_v11 = vmul.f32 -2.0, %v4023_v32  ;;  %v2672_v3 = vpop.eup %2671  ;;  %v2139_v52 = vsel %vm2126_vm2, %v2110_v26, 0.0  ;;  %v2059_v27 = vsub.f32 %v2033_v15, %v2007_v22  ;;  %v4467_v22 = vld [vmem:[#allocation18_spill] sm:$0xff] }
 0x375   :  { %2681 = vpow2.f32 %v1742_v7  ;;  %v4082_v8 = vmul.f32 -2.0, %v4027_v63  ;;  %2177 = vadd.xlane.f32.xlu0 %v2139_v52  ;;  %2223 = vst [vmem:[#allocation8 + $0x120] sm:$0xff] %v2672_v3  ;;  %v1900_v58 = vmul.f32 %v2664_v62, %v1899_v1  ;;  %vm4086_vm1 = vcmp.lt.f32.partialorder %v1901_v0, 0.0004427343  ;;  %v4465_v0 = vld [vmem:[#allocation28_spill] sm:$0xff] }
 0x376   :  { %v1700_v56 = vsub.f32 0.0, %v1674_v5  ;;  %v1675_v46 = vand.u32 2147483647, %v4075_v11  ;;  %2683 = vtanh.f32 %v4027_v63  ;;  %v2085_v10 = vmul.f32 2.0, %v2059_v27 }
 0x377   :  { %v1676_v30 = vand.u32 2147483647, %v4082_v8  ;;  %v2674_v15 = vpop.eup %2673  ;;  %v4093_v33 = vadd.f32 %v3831_v28, %v3754_v48  ;;  %v4097_v24 = vadd.f32 %v3870_v16, %v3775_v49  ;;  %v4102_v41 = vadd.f32 %v3877_v2, %v3784_v55 }
 0x378   :  { %v1744_v29 = vmul.f32 1.442695, %v1700_v56  ;;  %v1701_v20 = vsub.f32 0.0, %v1675_v46  ;;  %v2111_v62 = vsub.f32 %v4464_v13, %v2085_v10  ;;  %v1888_v25 = vmul.f32 0.6931472, %v2674_v15  ;;  %v4469_v46 = vld [vmem:[#allocation14_spill] sm:$0xff] }
 0x379   :  { %v2676_v23 = vpop.eup %2675  ;;  %v1702_v50 = vsub.f32 0.0, %v1676_v30  ;;  %v4105_v38 = vmul.f32 -2.0, %v4093_v33  ;;  %v2034_v2 = vsub.f32 0.6931472, %v3889_v45  ;;  %v1572_v19 = vsub.f32 %v4465_v0, %v3700_v39  ;;  %v4470_v30 = vld [vmem:[#allocation22_spill] sm:$0xff] }
 0x37a   :  { %v1897_v59 = vmul.f32 0.6931472, %v2676_v23  ;;  %2685 = vpow2.f32 %v1744_v29  ;;  %v1746_v57 = vmul.f32 1.442695, %v1701_v20  ;;  %v4107_v48 = vpop.eup %2677  ;;  %v2140_v49 = vsel %vm2126_vm2, %v2111_v62, 0.0 }
 0x37b   :  { %v1894_v28 = vsel %vm4068_vm0, %v1891_v36, %v1888_v25  ;;  %v1748_v16 = vmul.f32 1.442695, %v1702_v50  ;;  %2687 = vtanh.f32 %v4093_v33  ;;  %2179 = vadd.xlane.f32.xlu1 %v2140_v49  ;;  %v1904_v40 = vadd.f32 1.0, %v4107_v48 }
 0x37c   :  { %v2008_v55 = vadd.f32 %v1894_v28, %v1644_v6  ;;  %v1903_v4 = vsel %vm4086_vm1, %v1900_v58, %v1897_v59  ;;  %v2680_v35 = vpop.eup %2679  ;;  %v2035_v47 = vsub.f32 0.6931472, %v3893_v9  ;;  %2689 = vpow2.f32 %v1746_v57  ;;  %v4136_v9 = vld [vmem:[#allocation2 + $0xc8] sm:$0xff] }
 0x37d   :  { %v2009_v43 = vadd.f32 %v1903_v4, %v1645_v34  ;;  %v1284_v1 = vadd.f32 %v3726_v60, %v3209_v21  ;;  %2691 = vlog2.f32 %v1904_v40  ;;  %2224 = vst [vmem:[#allocation8 + $0x130] sm:$0xff] %v2680_v35  ;;  %v1677_v45 = vand.u32 2147483647, %v4105_v38  ;;  %v4468_v34 = vld [vmem:[#allocation23_spill] sm:$0xff] }
 0x37e   :  { %v2060_v6 = vsub.f32 %v2034_v2, %v2008_v55  ;;  %v1446_v26 = vmul.f32 %v4466_v18, %v4125_v51  ;;  %v4134_v7 = vadd.f32 %v4467_v22, %v3209_v21  ;;  %2693 = vpow2.f32 %v1748_v16 }
 0x37f   :  { %v4128_v12 = vpop.eup %2681  ;;  %v2061_v61 = vsub.f32 %v2035_v47, %v2009_v43  ;;  %v4140_v5 = vmul.f32 %v4468_v34, %v4136_v9  ;;  %v1646_v52 = vmax.f32 %v4000_v44, 0.0  ;;  %v1907_v56 = vmul.f32 -0.5, %v4107_v48 }
 0x380   :  { %v2684_v60 = vpop.eup %2683  ;;  %v2086_v3 = vmul.f32 2.0, %v2060_v6  ;;  %v1913_v27 = vadd.f32 1.0, %v4128_v12  ;;  %v1703_v21 = vsub.f32 0.0, %v1677_v45  ;;  %2695 = vtanh.f32 %v4097_v24 }
 0x381   :  { %v2087_v36 = vmul.f32 2.0, %v2061_v61  ;;  %2225 = vst [vmem:[#allocation8 + $0x140] sm:$0xff] %v2684_v60  ;;  %v2036_v58 = vsub.f32 0.6931472, %v3983_v14  ;;  %v4149_v42 = vmul.f32 -2.0, %v4097_v24  ;;  %v1647_v44 = vmax.f32 %v4034_v54, 0.0 }
 0x382   :  { %v2112_v10 = vsub.f32 %v4469_v46, %v2086_v3  ;;  %2697 = vlog2.f32 %v1913_v27  ;;  %v2037_v29 = vsub.f32 0.6931472, %v4015_v17  ;;  %v1750_v20 = vmul.f32 1.442695, %v1703_v21 }
 0x383   :  { %v2113_v15 = vsub.f32 %v4470_v30, %v2087_v36  ;;  %v1916_v62 = vmul.f32 -0.5, %v4128_v12  ;;  %v2038_v14 = vsub.f32 0.6931472, %v4019_v37  ;;  %v1678_v25 = vand.u32 2147483647, %v4149_v42  ;;  %v4475_v37 = vld [vmem:[#allocation34_spill] sm:$0xff] }
 0x384   :  { %v4154_v23 = vpop.eup %2685  ;;  %v2141_v13 = vsel %vm2126_vm2, %v2112_v10, 0.0  ;;  %v1908_v57 = vadd.f32 1.0, %v1907_v56  ;;  %v1648_v49 = vmax.f32 %v4062_v31, 0.0  ;;  %v1910_v16 = vand.u32 2147483647, %v4107_v48 }
 0x385   :  { %v2688_v50 = vpop.eup %2687  ;;  %2181 = vadd.xlane.f32.xlu0 %v2141_v13  ;;  %v2142_v59 = vsel %vm2126_vm2, %v2113_v15, 0.0  ;;  %v1922_v28 = vadd.f32 1.0, %v4154_v23  ;;  %v2039_v55 = vsub.f32 0.6931472, %v4023_v32  ;;  %2699 = vpow2.f32 %v1750_v20 }
 0x386   :  { %2183 = vadd.xlane.f32.xlu1 %v2142_v59  ;;  %2226 = vst [vmem:[#allocation8 + $0x150] sm:$0xff] %v2688_v50  ;;  %v1704_v2 = vsub.f32 0.0, %v1678_v25  ;;  %v4167_v4 = vpop.eup %2689  ;;  %v1649_v40 = vmax.f32 %v4075_v11, 0.0  ;;  %v1650_v35 = vmax.f32 %v4082_v8, 0.0  ;;  %v4171_v43 = vadd.f32 %v1446_v26, %v1284_v1 }
 0x387   :  { %2701 = vlog2.f32 %v1922_v28  ;;  %v2692_v47 = vpop.eup %2691  ;;  %v1917_v6 = vadd.f32 1.0, %v1916_v62  ;;  %v1931_v45 = vadd.f32 1.0, %v4167_v4  ;;  %v4175_v22 = vmul.f32 -2.0, %v4102_v41 }
 0x388   :  { %v1752_v18 = vmul.f32 1.442695, %v1704_v2  ;;  %v4177_v61 = vpop.eup %2693  ;;  %v1906_v60 = vmul.f32 0.6931472, %v2692_v47  ;;  %v1909_v34 = vmul.f32 %v4107_v48, %v1908_v57  ;;  %v1925_v3 = vmul.f32 -0.5, %v4154_v23 }
 0x389   :  { %2703 = vtanh.f32 %v4102_v41  ;;  %vm1911_vm3 = vcmp.lt.f32.partialorder %v1910_v16, 0.0004427343  ;;  %v1919_v1 = vand.u32 2147483647, %v4128_v12  ;;  %v1940_v26 = vadd.f32 1.0, %v4177_v61 }
 0x38a   :  { %2705 = vlog2.f32 %v1931_v45  ;;  %v2696_v27 = vpop.eup %2695  ;;  %v1912_v36 = vsel %vm1911_vm3, %v1909_v34, %v1906_v60  ;;  %v1928_v56 = vand.u32 2147483647, %v4154_v23  ;;  %v1934_v21 = vmul.f32 -0.5, %v4167_v4 }
 0x38b   :  { %2707 = vpow2.f32 %v1752_v18  ;;  %v2010_v10 = vadd.f32 %v1912_v36, %v1646_v52  ;;  %v1918_v48 = vmul.f32 %v4128_v12, %v1917_v6  ;;  %2227 = vst [vmem:[#allocation8 + $0x160] sm:$0xff] %v2696_v27  ;;  %v1679_v30 = vand.u32 2147483647, %v4175_v22 }
 0x38c   :  { %v2698_v46 = vpop.eup %2697  ;;  %2709 = vlog2.f32 %v1940_v26  ;;  %v1926_v20 = vadd.f32 1.0, %v1925_v3  ;;  %v1943_v13 = vmul.f32 -0.5, %v4177_v61  ;;  %vm1920_vm4 = vcmp.lt.f32.partialorder %v1919_v1, 0.0004427343  ;;  %v4473_v3 = vld [vmem:[#allocation25_spill] sm:$0xff] }
 0x38d   :  { %v1915_v15 = vmul.f32 0.6931472, %v2698_v46  ;;  %2711 = vtanh.f32 %v4171_v43  ;;  %v2062_v62 = vsub.f32 %v2036_v58, %v2010_v10  ;;  %v1705_v25 = vsub.f32 0.0, %v1679_v30  ;;  %v4474_v30 = vld [vmem:[#allocation16_spill] sm:$0xff] }
 0x38e   :  { %v4191_v50 = vmul.f32 -2.0, %v4171_v43  ;;  %vm4193_vm5 = vcmp.lt.f32.partialorder %v1928_v56, 0.0004427343  ;;  %v1935_v12 = vadd.f32 1.0, %v1934_v21  ;;  %v4199_v57 = vadd.f32 %v4140_v5, %v4134_v7 }
 0x38f   :  { %v1921_v59 = vsel %vm1920_vm4, %v1918_v48, %v1915_v15  ;;  %v4201_v28 = vpop.eup %2699  ;;  %v2088_v16 = vmul.f32 2.0, %v2062_v62  ;;  %v1937_v2 = vand.u32 2147483647, %v4167_v4  ;;  %v1754_v47 = vmul.f32 1.442695, %v1705_v25 }
 0x390   :  { %v2011_v58 = vadd.f32 %v1921_v59, %v1647_v44  ;;  %v1927_v45 = vmul.f32 %v4154_v23, %v1926_v20  ;;  %v1944_v18 = vadd.f32 1.0, %v1943_v13  ;;  %v1949_v60 = vadd.f32 1.0, %v4201_v28 }
 0x391   :  { %v2702_v6 = vpop.eup %2701  ;;  %v1680_v34 = vand.u32 2147483647, %v4191_v50  ;;  %v2114_v7 = vsub.f32 %v4473_v3, %v2088_v16  ;;  %2713 = vpow2.f32 %v1754_v47  ;;  %v1936_v44 = vmul.f32 %v4167_v4, %v1935_v12  ;;  %v4477_v3 = vld [vmem:[#allocation27_spill] sm:$0xff] }
 0x392   :  { %v2063_v5 = vsub.f32 %v2037_v29, %v2011_v58  ;;  %v1924_v1 = vmul.f32 0.6931472, %v2702_v6  ;;  %v1946_v26 = vand.u32 2147483647, %v4177_v61  ;;  %2715 = vlog2.f32 %v1949_v60 }
 0x393   :  { %v2704_v54 = vpop.eup %2703  ;;  %v1706_v27 = vsub.f32 0.0, %v1680_v34  ;;  %v2143_v36 = vsel %vm2126_vm2, %v2114_v7, 0.0  ;;  %2717 = vtanh.f32 %v4199_v57  ;;  %v1952_v46 = vmul.f32 -0.5, %v4201_v28  ;;  %v4478_v7 = vld [vmem:[#allocation15_spill] sm:$0xff] }
 0x394   :  { %v2706_v23 = vpop.eup %2705  ;;  %v2089_v56 = vmul.f32 2.0, %v2063_v5  ;;  %v1930_v21 = vsel %vm4193_vm5, %v1927_v45, %v1924_v1  ;;  %2228 = vst [vmem:[#allocation8 + $0x170] sm:$0xff] %v2704_v54  ;;  %2185 = vadd.xlane.f32.xlu0 %v2143_v36  ;;  %vm1938_vm6 = vcmp.lt.f32.partialorder %v1937_v2, 0.0004427343  ;;  %v1945_v20 = vmul.f32 %v4177_v61, %v1944_v18 }
 0x395   :  { %v4219_v17 = vpop.eup %2707  ;;  %v2012_v29 = vadd.f32 %v1930_v21, %v1648_v49  ;;  %v1933_v4 = vmul.f32 0.6931472, %v2706_v23  ;;  %v1756_v10 = vmul.f32 1.442695, %v1706_v27  ;;  %vm1947_vm7 = vcmp.lt.f32.partialorder %v1946_v26, 0.0004427343 }
 0x396   :  { %v2710_v48 = vpop.eup %2709  ;;  %v2115_v15 = vsub.f32 %v4474_v30, %v2089_v56  ;;  %v1958_v13 = vadd.f32 1.0, %v4219_v17  ;;  %v1953_v16 = vadd.f32 1.0, %v1952_v46  ;;  %v4234_v58 = vmul.f32 -2.0, %v4199_v57  ;;  %v4480_v46 = vld [vmem:[#allocation17_spill] sm:$0xff] }
 0x397   :  { %v2712_v62 = vpop.eup %2711  ;;  %v2064_v25 = vsub.f32 %v2038_v14, %v2012_v29  ;;  %v1939_v59 = vsel %vm1938_vm6, %v1936_v44, %v1933_v4  ;;  %v1942_v52 = vmul.f32 0.6931472, %v2710_v48  ;;  %2719 = vpow2.f32 %v1756_v10  ;;  %v4481_v10 = vld [vmem:[#allocation29_spill] sm:$0xff] }
 0x398   :  { %v2144_v31 = vsel %vm2126_vm2, %v2115_v15, 0.0  ;;  %v2013_v49 = vadd.f32 %v1939_v59, %v1649_v40  ;;  %2721 = vlog2.f32 %v1958_v13  ;;  %2229 = vst [vmem:[#allocation8 + $0x180] sm:$0xff] %v2712_v62  ;;  %v1522_v14 = vmul.f32 -0.5, %v4475_v37  ;;  %v4476_v40 = vld [vmem:[#allocation19_spill] sm:$0xff] }
 0x399   :  { %2187 = vadd.xlane.f32.xlu1 %v2144_v31  ;;  %v2090_v61 = vmul.f32 2.0, %v2064_v25  ;;  %v1948_v12 = vsel %vm1947_vm7, %v1945_v20, %v1942_v52  ;;  %v2040_v11 = vsub.f32 0.6931472, %v4027_v63  ;;  %v1955_v45 = vand.u32 2147483647, %v4201_v28 }
 0x39a   :  { %v2065_v2 = vsub.f32 %v2039_v55, %v2013_v49  ;;  %v2014_v47 = vadd.f32 %v1948_v12, %v1650_v35  ;;  %v1961_v18 = vmul.f32 -0.5, %v4219_v17  ;;  %v1681_v60 = vand.u32 2147483647, %v4234_v58 }
 0x39b   :  { %v2116_v6 = vsub.f32 %v4476_v40, %v2090_v61  ;;  %v4246_v34 = vpop.eup %2713  ;;  %v4479_v5 = vsub.f32 %v4477_v3, %v4478_v7  ;;  %v2389_v8 = vadd.f32 -0.9189385, %v1572_v19  ;;  %v1651_v54 = vmax.f32 %v4105_v38, 0.0 }
 0x39c   :  { %v2091_v55 = vmul.f32 2.0, %v2065_v2  ;;  %v2066_v63 = vsub.f32 %v2040_v11, %v2014_v47  ;;  %v2716_v35 = vpop.eup %2715  ;;  %v1954_v44 = vmul.f32 %v4201_v28, %v1953_v16  ;;  %v1967_v26 = vadd.f32 1.0, %v4246_v34  ;;  %v4482_v16 = vld [vmem:[#allocation35_spill] sm:$0xff] }
 0x39d   :  { %v2388_v32 = vadd.f32 -0.9189385, %v4479_v5  ;;  %v2145_v1 = vsel %vm2126_vm2, %v2116_v6, 0.0  ;;  %v2718_v27 = vpop.eup %2717  ;;  %v1951_v56 = vmul.f32 0.6931472, %v2716_v35  ;;  %v1707_v21 = vsub.f32 0.0, %v1681_v60 }
 0x39e   :  { %2189 = vadd.xlane.f32.xlu0 %v2145_v1  ;;  %v2092_v36 = vmul.f32 2.0, %v2066_v63  ;;  %vm1956_vm8 = vcmp.lt.f32.partialorder %v1955_v45, 0.0004427343  ;;  %v1962_v39 = vadd.f32 1.0, %v1961_v18  ;;  %v1964_v0 = vand.u32 2147483647, %v4219_v17 }
 0x39f   :  { %v2117_v23 = vsub.f32 %v2388_v32, %v2091_v55  ;;  %2723 = vlog2.f32 %v1967_v26  ;;  %2230 = vst [vmem:[#allocation8 + $0x190] sm:$0xff] %v2718_v27  ;;  %v1957_v29 = vsel %vm1956_vm8, %v1954_v44, %v1951_v56  ;;  %v1758_v28 = vmul.f32 1.442695, %v1707_v21  ;;  %v4483_v47 = vld [vmem:[#allocation39_spill] sm:$0xff] }
 0x3a0   :  { %v2118_v38 = vsub.f32 %v2389_v8, %v2092_v36  ;;  %v1573_v48 = vsub.f32 %v4481_v10, %v4480_v46  ;;  %v2015_v30 = vadd.f32 %v1957_v29, %v1651_v54  ;;  %v2041_v15 = vsub.f32 0.6931472, %v4093_v33  ;;  %v4484_v36 = vld [vmem:[#allocation40_spill] sm:$0xff] }
 0x3a1   :  { %v2146_v19 = vsel %vm2126_vm2, %v2117_v23, 0.0  ;;  %v4262_v4 = vpop.eup %2719  ;;  %v2154_v20 = vpop.xlane.xlu0 %2153  ;;  %v1548_v62 = vmul.f32 %v1522_v14, %v4475_v37  ;;  %v1970_v59 = vmul.f32 -0.5, %v4246_v34  ;;  %v1963_v61 = vmul.f32 %v4219_v17, %v1962_v39 }
 0x3a2   :  { %2191 = vadd.xlane.f32.xlu1 %v2146_v19  ;;  %v2722_v13 = vpop.eup %2721  ;;  %v2147_v25 = vsel %vm2126_vm2, %v2118_v38, 0.0  ;;  %v1976_v52 = vadd.f32 1.0, %v4262_v4  ;;  %2231 = vst [vmem:[#allocation8 + $0x8] sm:$0xff] %v2154_v20  ;;  %v2067_v31 = vsub.f32 %v2041_v15, %v2015_v30  ;;  %2725 = vpow2.f32 %v1758_v28  ;;  %v4485_v15 = vld [vmem:[#allocation20_spill] sm:$0xff] }
 0x3a3   :  { %2193 = vadd.xlane.f32.xlu0 %v2147_v25  ;;  %v1960_v49 = vmul.f32 0.6931472, %v2722_v13  ;;  %v1652_v33 = vmax.f32 %v4149_v42, 0.0  ;;  %vm1965_vm9 = vcmp.lt.f32.partialorder %v1964_v0, 0.0004427343  ;;  %v1523_v37 = vmul.f32 -0.5, %v4482_v16 }
 0x3a4   :  { %2727 = vlog2.f32 %v1976_v52  ;;  %v2390_v12 = vadd.f32 -0.9189385, %v1573_v48  ;;  %v2093_v14 = vmul.f32 2.0, %v2067_v31  ;;  %v1574_v11 = vsub.f32 %v1548_v62, %v4483_v47 }
 0x3a5   :  { %v1966_v2 = vsel %vm1965_vm9, %v1963_v61, %v1960_v49  ;;  %v2042_v6 = vsub.f32 0.6931472, %v4097_v24  ;;  %v1971_v45 = vadd.f32 1.0, %v1970_v59  ;;  %v1973_v60 = vand.u32 2147483647, %v4246_v34 }
 0x3a6   :  { %v2016_v40 = vadd.f32 %v1966_v2, %v1652_v33  ;;  %v2119_v18 = vsub.f32 %v2390_v12, %v2093_v14  ;;  %v1979_v17 = vmul.f32 -0.5, %v4262_v4  ;;  %v1549_v7 = vmul.f32 %v1523_v37, %v4482_v16 }
 0x3a7   :  { %v1524_v5 = vmul.f32 -0.5, %v4125_v51  ;;  %v2391_v55 = vadd.f32 -0.9189385, %v1574_v11  ;;  %v1972_v35 = vmul.f32 %v4246_v34, %v1971_v45  ;;  %v1653_v1 = vmax.f32 %v4175_v22, 0.0  ;;  %v4486_v11 = vld [vmem:[#allocation30_spill] sm:$0xff] }
 0x3a8   :  { %v2068_v3 = vsub.f32 %v2042_v6, %v2016_v40  ;;  %v2148_v32 = vsel %vm2126_vm2, %v2119_v18, 0.0  ;;  %v2156_v8 = vpop.xlane.xlu0 %2155  ;;  %vm1974_vm10 = vcmp.lt.f32.partialorder %v1973_v60, 0.0004427343  ;;  %v1980_v54 = vadd.f32 1.0, %v1979_v17 }
 0x3a9   :  { %v2724_v42 = vpop.eup %2723  ;;  %2195 = vadd.xlane.f32.xlu1 %v2148_v32  ;;  %2232 = vst [vmem:[#allocation8 + $0x18] sm:$0xff] %v2156_v8  ;;  %v1982_v27 = vand.u32 2147483647, %v4262_v4  ;;  %v1575_v56 = vsub.f32 %v1549_v7, %v4484_v36  ;;  %v2043_v39 = vsub.f32 0.6931472, %v4102_v41  ;;  %v1550_v38 = vmul.f32 %v1524_v5, %v4125_v51 }
 0x3aa   :  { %v2094_v63 = vmul.f32 2.0, %v2068_v3  ;;  %v1969_v24 = vmul.f32 0.6931472, %v2724_v42  ;;  %v1981_v46 = vmul.f32 %v4262_v4, %v1980_v54  ;;  %v1654_v10 = vmax.f32 %v4191_v50, 0.0 }
 0x3ab   :  { %vm1983_vm11 = vcmp.lt.f32.partialorder %v1982_v27, 0.0004427343  ;;  %v2392_v48 = vadd.f32 -0.9189385, %v1575_v56  ;;  %v1576_v20 = vsub.f32 %v1550_v38, %v4485_v15  ;;  %v2044_v13 = vsub.f32 0.6931472, %v4171_v43 }
 0x3ac   :  { %v2120_v44 = vsub.f32 %v2391_v55, %v2094_v63  ;;  %v1975_v26 = vsel %vm1974_vm10, %v1972_v35, %v1969_v24  ;;  %v2726_v23 = vpop.eup %2725  ;;  %v1525_v4 = vmul.f32 -0.5, %v4136_v9  ;;  %v1655_v2 = vmax.f32 %v4234_v58, 0.0 }
 0x3ad   :  { %v2017_v21 = vadd.f32 %v1975_v26, %v1653_v1  ;;  %v1985_v22 = vadd.f32 1.0, %v2726_v23  ;;  %v1988_v25 = vmul.f32 -0.5, %v2726_v23  ;;  %v2393_v31 = vadd.f32 -0.9189385, %v1576_v20 }
 0x3ae   :  { %v2158_v0 = vpop.xlane.xlu1 %2157  ;;  %v2728_v19 = vpop.eup %2727  ;;  %v2149_v34 = vsel %vm2126_vm2, %v2120_v44, 0.0  ;;  %v1991_v33 = vand.u32 2147483647, %v2726_v23  ;;  %v1551_v16 = vmul.f32 %v1525_v4, %v4136_v9  ;;  %v2045_v45 = vsub.f32 0.6931472, %v4199_v57 }
 0x3af   :  { %2233 = vst [vmem:[#allocation8 + $0x28] sm:$0xff] %v2158_v0  ;;  %2197 = vadd.xlane.f32.xlu0 %v2149_v34  ;;  %v2069_v29 = vsub.f32 %v2043_v39, %v2017_v21  ;;  %v1978_v28 = vmul.f32 0.6931472, %v2728_v19  ;;  %2729 = vlog2.f32 %v1985_v22  ;;  %v1989_v49 = vadd.f32 1.0, %v1988_v25 }
 0x3b0   :  { %vm1992_vm12 = vcmp.lt.f32.partialorder %v1991_v33, 0.0004427343  ;;  %v1577_v40 = vsub.f32 %v1551_v16, %v4486_v11 }
 0x3b1   :  { %v2095_v41 = vmul.f32 2.0, %v2069_v29  ;;  %v1984_v30 = vsel %vm1983_vm11, %v1981_v46, %v1978_v28  ;;  %v1990_v14 = vmul.f32 %v2726_v23, %v1989_v49 }
 0x3b2   :  { %v2018_v51 = vadd.f32 %v1984_v30, %v1654_v10  ;;  %v2394_v17 = vadd.f32 -0.9189385, %v1577_v40 }
 0x3b3   :  { %v2121_v62 = vsub.f32 %v2392_v48, %v2095_v41 }
 0x3b4   :  { %v2070_v59 = vsub.f32 %v2044_v13, %v2018_v51 }
 0x3b5   :  { %v2150_v52 = vsel %vm2126_vm2, %v2121_v62, 0.0 }
 0x3b6   :  { %2199 = vadd.xlane.f32.xlu1 %v2150_v52  ;;  %v2096_v50 = vmul.f32 2.0, %v2070_v59 }
 0x3b8   :  { %v2122_v61 = vsub.f32 %v2393_v31, %v2096_v50 }
 0x3b9   :  { %v2730_v12 = vpop.eup %2729 }
 0x3ba   :  { %v2151_v43 = vsel %vm2126_vm2, %v2122_v61, 0.0  ;;  %v1987_v37 = vmul.f32 0.6931472, %v2730_v12 }
 0x3bb   :  { %2201 = vadd.xlane.f32.xlu0 %v2151_v43 }
 0x3bc   :  { %v1993_v47 = vsel %vm1992_vm12, %v1990_v14, %v1987_v37 }
 0x3bd   :  { %v2019_v6 = vadd.f32 %v1993_v47, %v1655_v2 }
 0x3bf   :  { %v2071_v18 = vsub.f32 %v2045_v45, %v2019_v6 }
 0x3c0   :  { %v2160_v60 = vpop.xlane.xlu1 %2159 }
 0x3c1   :  { %2234 = vst [vmem:[#allocation8 + $0x38] sm:$0xff] %v2160_v60  ;;  %v2097_v9 = vmul.f32 2.0, %v2071_v18 }
 0x3c3   :  { %v2123_v3 = vsub.f32 %v2394_v17, %v2097_v9 }
 0x3c5   :  { %v2152_v42 = vsel %vm2126_vm2, %v2123_v3, 0.0 }
 0x3c6   :  { %2203 = vadd.xlane.f32.xlu1 %v2152_v42 }
 0x3c7   :  { %v2162_v7 = vpop.xlane.xlu0 %2161 }
 0x3c8   :  { %2235 = vst [vmem:[#allocation8 + $0x48] sm:$0xff] %v2162_v7 }
 0x3d6   :  { %v2164_v58 = vpop.xlane.xlu1 %2163 }
 0x3d7   :  { %2236 = vst [vmem:[#allocation8 + $0x58] sm:$0xff] %v2164_v58 }
 0x3e4   :  { %v2166_v5 = vpop.xlane.xlu0 %2165 }
 0x3e5   :  { %2237 = vst [vmem:[#allocation8 + $0x68] sm:$0xff] %v2166_v5 }
 0x3ea   :  { %v2168_v32 = vpop.xlane.xlu1 %2167 }
 0x3eb   :  { %2238 = vst [vmem:[#allocation8 + $0x78] sm:$0xff] %v2168_v32 }
 0x3f1   :  { %v2170_v8 = vpop.xlane.xlu0 %2169 }
 0x3f2   :  { %2239 = vst [vmem:[#allocation8 + $0x88] sm:$0xff] %v2170_v8 }
 0x3f4   :  { %v2172_v57 = vpop.xlane.xlu1 %2171 }
 0x3f5   :  { %2240 = vst [vmem:[#allocation8 + $0x98] sm:$0xff] %v2172_v57 }
 0x3f9   :  { %v2174_v55 = vpop.xlane.xlu0 %2173 }
 0x3fa   :  { %2241 = vst [vmem:[#allocation8 + $0xa8] sm:$0xff] %v2174_v55 }
 0x400   :  { %v2176_v63 = vpop.xlane.xlu1 %2175 }
 0x401   :  { %2242 = vst [vmem:[#allocation8 + $0xb8] sm:$0xff] %v2176_v63 }
 0x402   :  { %v2178_v24 = vpop.xlane.xlu0 %2177 }
 0x403   :  { %2243 = vst [vmem:[#allocation8 + $0xc8] sm:$0xff] %v2178_v24 }
 0x408   :  { %v2180_v53 = vpop.xlane.xlu1 %2179 }
 0x409   :  { %2244 = vst [vmem:[#allocation8 + $0xd8] sm:$0xff] %v2180_v53 }
 0x412   :  { %v2182_v35 = vpop.xlane.xlu0 %2181 }
 0x413   :  { %2245 = vst [vmem:[#allocation8 + $0xe8] sm:$0xff] %v2182_v35  ;;  %v2184_v1 = vpop.xlane.xlu1 %2183 }
 0x414   :  { %2246 = vst [vmem:[#allocation8 + $0xf8] sm:$0xff] %v2184_v1 }
 0x421   :  { %v2186_v54 = vpop.xlane.xlu0 %2185 }
 0x422   :  { %2247 = vst [vmem:[#allocation8 + $0x108] sm:$0xff] %v2186_v54 }
 0x426   :  { %v2188_v44 = vpop.xlane.xlu1 %2187 }
 0x427   :  { %2248 = vst [vmem:[#allocation8 + $0x118] sm:$0xff] %v2188_v44 }
 0x42b   :  { %v2190_v26 = vpop.xlane.xlu0 %2189 }
 0x42c   :  { %2249 = vst [vmem:[#allocation8 + $0x128] sm:$0xff] %v2190_v26 }
 0x42f   :  { %v2192_v27 = vpop.xlane.xlu1 %2191 }
 0x430   :  { %2250 = vst [vmem:[#allocation8 + $0x138] sm:$0xff] %v2192_v27  ;;  %v2194_v23 = vpop.xlane.xlu0 %2193 }
 0x431   :  { %2251 = vst [vmem:[#allocation8 + $0x148] sm:$0xff] %v2194_v23 }
 0x436   :  { %v2196_v36 = vpop.xlane.xlu1 %2195 }
 0x437   :  { %2252 = vst [vmem:[#allocation8 + $0x158] sm:$0xff] %v2196_v36 }
 0x43c   :  { %v2198_v56 = vpop.xlane.xlu0 %2197 }
 0x43d   :  { %2253 = vst [vmem:[#allocation8 + $0x168] sm:$0xff] %v2198_v56 }
 0x443   :  { %v2200_v21 = vpop.xlane.xlu1 %2199 }
 0x444   :  { %2254 = vst [vmem:[#allocation8 + $0x178] sm:$0xff] %v2200_v21 }
 0x448   :  { %v2202_v39 = vpop.xlane.xlu0 %2201 }
 0x449   :  { %2255 = vst [vmem:[#allocation8 + $0x188] sm:$0xff] %v2202_v39 }
 0x453   :  { %v2204_v0 = vpop.xlane.xlu1 %2203 }
 0x454   :  { %2256 = vst [vmem:[#allocation8 + $0x198] sm:$0xff] %v2204_v0 }
 0x455   :  { %2808 = shalt.err (!%p2805_p0)
}
 0x456   :  { %s2809_s10 = scalar_lea.hbm %s4326_s8, 6656 }
 0x457   :  { %p2810_p1 = scmp.ne.s32.totalorder %s4326_s8, %s2809_s10  ;;  %p2813_p2 = scmp.lt.u32.totalorder %s2809_s10, %s4326_s8 }
 0x459   :  { %p2815_p3 = pnand %p2813_p2, %p2810_p1 }
 0x45b   :  { %2818 = shalt.err (!%p2815_p3)
}
 0x45c   :  { %s2832_s15 = smov 256   ;;  %s2833_s16 = smov 16  }
 0x45d   :  { %2268 = dma.vmem_to_hbm [thread:$0]  %s2263_s4, 6656, %s4326_s8, [#allocation4], %s2832_s15, %s2832_s15, %s2833_s16  }
 0x45e   :  { %2823 = dma.done.wait [#allocation4], 6656  }
 0x45f   :  { %2824 = vsyncadd [#allocation4], 4294960640 }
 0x460   :  { %2272 = vsyncpa [#allocation3], 1 }
 0x461   :  { %2273 = vsyncpa [#allocation6], 1 }
 0x462   :  { %2274 = vsyncpa [#allocation4], 1 }

</bundles_post_ra>
